<compile_context>
chip_gen: v7x
topology: tpu7x:2x2x1
jax: 0.10.0
libtpu: 0.0.40
codegen_flags: <defaults>
</compile_context>

<pallas_src>
import functools

import jax
import jax.numpy as jnp
from jax.experimental import pallas as pl
from jax.experimental.pallas import tpu as pltpu

_LANE = 128      # vreg lane width
_SUBLANE = 8     # vreg sublane count


def _round_up(x, m):
    return ((x + m - 1) // m) * m


@functools.lru_cache(maxsize=1)
def _vmem_capacity_bytes():
    """Physical VMEM per TensorCore; conservative fallback = v7x (64 MiB)."""
    try:
        return int(pltpu.get_tpu_info().vmem_capacity_bytes)
    except Exception:
        return 64 * 1024 * 1024


def _vmem_limit_bytes():
    # Raise the scoped-VMEM limit but stay well under physical capacity.
    return int(_vmem_capacity_bytes() * 0.7)


def _num_row_tiles(n_batch, oh, ow, cout_p):
    """Split output rows so the (fully parallel) grid has >= 4 steps for
    v7x's two TensorCores and the f32 accumulator stays modest, without
    fragmenting into needlessly small tiles."""
    acc_budget = 2 << 20          # bytes of f32 accumulator per grid step
    best = 1
    for d in range(1, oh + 1):
        if oh % d:
            continue
        tr = oh // d
        best = d
        if tr * ow * cout_p * 4 <= acc_budget and n_batch * d >= 4:
            break
        if tr <= 4:               # stop fragmenting
            break
    return best


# ----------------------------------------------------------------------------
# Pallas kernel: fused stride-1 conv (kd*kd shifted matmuls) + bias + ReLU.
# ----------------------------------------------------------------------------
def _conv_relu_kernel(x_ref, w_ref, b_ref, o_ref, *, kd, tr, ow):
    # x_ref: (HP, WP, Cin_p)          bf16 spatially pre-padded image (1 batch elem)
    # w_ref: (kd, kd, Cin_p, Cout_p)  bf16 conv taps (stride already folded in)
    # b_ref: (1, Cout_p)              f32
    # o_ref: (tr, ow, Cout_p)         bf16 (intermediate) / f32 (final layer)
    cin_p = x_ref.shape[-1]
    cout_p = o_ref.shape[-1]
    row0 = pl.multiple_of(pl.program_id(1) * tr, tr)

    acc = jnp.zeros((tr * ow, cout_p), jnp.float32)
    for a in range(kd):                       # static: unrolled kd*kd taps
        for b in range(kd):
            slab = x_ref[pl.ds(row0 + a, tr), pl.ds(b, ow), :]   # (tr, ow, cin_p)
            acc = acc + jnp.dot(slab.reshape(tr * ow, cin_p), w_ref[a, b],
                                preferred_element_type=jnp.float32)

    y = jnp.maximum(acc + b_ref[...], 0.0)                 # f32 epilogue (v5e-safe)
    o_ref[...] = y.reshape(tr, ow, cout_p).astype(o_ref.dtype)


def _fused_conv_relu(x_pad, w4, bias2d, *, kd, oh, ow, out_dtype):
    """x_pad: (N, HP, WP, Cin_p) bf16 pre-padded NHWC; w4: (kd,kd,Cin_p,Cout_p)
    bf16; bias2d: (1, Cout_p) f32 -> (N, oh, ow, Cout_p) activations (channels
    beyond the real Cout are exactly zero)."""
    n, hp, wp, cin_p = x_pad.shape
    cout_p = w4.shape[-1]
    n_rt = _num_row_tiles(n, oh, ow, cout_p)
    tr = oh // n_rt

    kernel = functools.partial(_conv_relu_kernel, kd=kd, tr=tr, ow=ow)
    out_bytes = jnp.dtype(out_dtype).itemsize
    cost = pl.CostEstimate(
        flops=2 * n * oh * ow * kd * kd * cin_p * cout_p,
        transcendentals=0,
        bytes_accessed=(x_pad.size * 2            # bf16 image
                        + w4.size * 2             # bf16 weights
                        + bias2d.size * 4         # f32 bias
                        + n * oh * ow * cout_p * out_bytes),
    )

    return pl.pallas_call(
        kernel,
        out_shape=jax.ShapeDtypeStruct((n, oh, ow, cout_p), out_dtype),
        grid_spec=pltpu.PrefetchScalarGridSpec(
            num_scalar_prefetch=0,
            grid=(n, n_rt),
            in_specs=[
                # Full (small) image resident per batch element; row tiles
                # slice it in VMEM, so it is DMA'd once per image.
                pl.BlockSpec((None, hp, wp, cin_p), lambda i, r: (i, 0, 0, 0)),
                pl.BlockSpec((kd, kd, cin_p, cout_p), lambda i, r: (0, 0, 0, 0)),
                pl.BlockSpec((1, cout_p), lambda i, r: (0, 0)),
            ],
            out_specs=pl.BlockSpec((None, tr, ow, cout_p),
                                   lambda i, r: (i, r, 0, 0)),
        ),
        compiler_params=pltpu.CompilerParams(
            dimension_semantics=("parallel", "parallel"),
            vmem_limit_bytes=_vmem_limit_bytes(),
        ),
        cost_estimate=cost,
    )(x_pad, w4, bias2d)


# ----------------------------------------------------------------------------
# Wrapper-side layout plumbing (no FLOPs): padding, space-to-depth, weight prep.
# ----------------------------------------------------------------------------
def _space_to_depth(x, s):
    n, h, w, c = x.shape
    x = x.reshape(n, h // s, s, w // s, s, c)
    x = jnp.transpose(x, (0, 1, 3, 2, 4, 5))
    return x.reshape(n, h // s, w // s, s * s * c)


def _prep_first_input(x_nhwc, s, pad, oh, ow, k):
    """Conv-pad the raw input; for strided layers also fold the stride into a
    space-to-depth transform so the kernel only ever runs stride-1 convs."""
    kd = -(-k // s)
    x = jnp.pad(x_nhwc, ((0, 0), (pad, pad), (pad, pad), (0, 0)))
    if s == 1:
        return x
    need_h = s * (oh + kd - 1)
    need_w = s * (ow + kd - 1)
    hp, wp = x.shape[1], x.shape[2]
    extra_h = max(0, need_h - hp)
    extra_w = max(0, need_w - wp)
    extra_h += (-(hp + extra_h)) % s
    extra_w += (-(wp + extra_w)) % s
    x = jnp.pad(x, ((0, 0), (0, extra_h), (0, extra_w), (0, 0)))
    return _space_to_depth(x, s)


def _pack_weights(w_pt, s, cin_pad_to, cout_pad_to):
    """(Cout, Cin, k, k) PyTorch conv weight -> (kd, kd, Cin_p, Cout_p) bf16,
    with the stride folded in via space-to-depth weight repacking."""
    cout, cin, k, _ = w_pt.shape
    w = jnp.transpose(w_pt, (2, 3, 1, 0))                  # (k, k, cin, cout)
    kd = -(-k // s)
    if s > 1:
        w = jnp.pad(w, ((0, kd * s - k), (0, kd * s - k), (0, 0), (0, 0)))
        w = w.reshape(kd, s, kd, s, cin, cout)             # (a, p, b, q, ci, co)
        w = jnp.transpose(w, (0, 2, 1, 3, 4, 5))           # (a, b, p, q, ci, co)
        w = w.reshape(kd, kd, s * s * cin, cout)
    cin_eff = w.shape[2]
    w = jnp.pad(w, ((0, 0), (0, 0),
                    (0, cin_pad_to - cin_eff), (0, cout_pad_to - cout)))
    return w.astype(jnp.bfloat16)


# ----------------------------------------------------------------------------
# VGGNet forward (2 conv layers by default, matching the PyTorch module).
# ----------------------------------------------------------------------------
def init_vggnet_params(key, in_channels, mid_channels, out_channels,
                       conv_kernel_size, num_conv_layers):
    """Deterministic synthetic params in PyTorch layout (Cout, Cin, KH, KW)."""
    params = []
    k = conv_kernel_size
    for layer in range(num_conv_layers):
        cin = in_channels if layer == 0 else mid_channels
        cout = out_channels if layer == num_conv_layers - 1 else mid_channels
        key, wk, bk = jax.random.split(key, 3)
        fan_in = cin * k * k
        bound = 1.0 / (fan_in ** 0.5)
        w = jax.random.uniform(wk, (cout, cin, k, k), jnp.float32,
                               minval=-bound, maxval=bound)
        b = jax.random.uniform(bk, (cout,), jnp.float32,
                               minval=-bound, maxval=bound)
        params.append((w, b))
    return params


@functools.partial(jax.jit, static_argnames=("conv_kernel_size", "subsample",
                                             "padding"))
def vggnet_forward(x_nchw, params, *, conv_kernel_size=3, subsample=2,
                   padding=None):
    """Returns the final activation in NCHW (the module's x).
    encoder_states (return_all_hiddens) is handled by the caller."""
    k = conv_kernel_size
    pad = k // 2 if padding is None else padding
    n_layers = len(params)

    x = jnp.transpose(x_nchw, (0, 2, 3, 1)).astype(jnp.bfloat16)   # -> NHWC bf16
    h, w = x.shape[1], x.shape[2]

    for layer, (w_pt, b) in enumerate(params):
        s = subsample if layer == 0 else 1
        cout = w_pt.shape[0]
        kd = -(-k // s)
        oh = (h + 2 * pad - k) // s + 1
        ow = (w + 2 * pad - k) // s + 1

        if layer == 0:
            xin = _prep_first_input(x, s, pad, oh, ow, k)
        else:
            # TODO(synk): fold this zero-pad into the previous layer's store
            # (padded-canvas output block) to drop one small HBM pass.
            xin = jnp.pad(x, ((0, 0), (pad, pad), (pad, pad), (0, 0)))

        cin_eff = xin.shape[-1]
        cin_p = _round_up(cin_eff, _SUBLANE)
        if cin_p != cin_eff:
            xin = jnp.pad(xin, ((0, 0), (0, 0), (0, 0), (0, cin_p - cin_eff)))
        cout_p = _round_up(cout, _LANE)                    # lane-dense output

        w4 = _pack_weights(w_pt, s, cin_p, cout_p)
        b2 = jnp.pad(b.astype(jnp.float32), (0, cout_p - cout)).reshape(1, cout_p)

        last = layer == n_layers - 1
        out_dtype = jnp.float32 if last else jnp.bfloat16  # bf16 intermediates
        x = _fused_conv_relu(xin, w4, b2, kd=kd, oh=oh, ow=ow,
                             out_dtype=out_dtype)          # (N, oh, ow, cout_p)
        h, w = oh, ow

    cout_final = params[-1][0].shape[0]
    return jnp.transpose(x[..., :cout_final], (0, 3, 1, 2))        # -> NCHW f32


# ----------------------------------------------------------------------------
# Reference: XLA conv with the same mixed precision (bf16 in, f32 accumulate).
# ----------------------------------------------------------------------------
def _reference_forward(x_nchw, params, conv_kernel_size=3, subsample=2):
    pad = conv_kernel_size // 2
    x = x_nchw.astype(jnp.float32)
    for layer, (w, b) in enumerate(params):
        stride = subsample if layer == 0 else 1
        y = jax.lax.conv_general_dilated(
            x.astype(jnp.bfloat16), w.astype(jnp.bfloat16),
            window_strides=(stride, stride),
            padding=((pad, pad), (pad, pad)),
            dimension_numbers=("NCHW", "OIHW", "NCHW"),
            preferred_element_type=jnp.float32)
        x = jnp.maximum(y + b.reshape(1, -1, 1, 1), 0.0)
    return x


if __name__ == "__main__":
    # Small shapes consistent with the module's forward pass.
    N, CIN, H, W = 2, 4, 16, 16
    MID, COUT, K, SUB, NLAYERS = 8, 8, 3, 2, 2

    key = jax.random.PRNGKey(0)
    key, xkey = jax.random.split(key)
    x = jax.random.normal(xkey, (N, CIN, H, W), jnp.float32)

    params = init_vggnet_params(key, CIN, MID, COUT, K, NLAYERS)

    out = vggnet_forward(x, params, conv_kernel_size=K, subsample=SUB)
    out = jax.block_until_ready(out)
    encoder_states = []  # return_all_hiddens=False default in the module

    ref = _reference_forward(x, params, conv_kernel_size=K, subsample=SUB)
    assert out.shape == ref.shape == (N, COUT, H // SUB, W // SUB), out.shape
    err = float(jnp.max(jnp.abs(out - ref)))
    assert err < 5e-3, err

    print("KERNEL_OK")
</pallas_src>

<mosaic_0001>
module attributes {stable_mosaic.version = 11 : i64} {
  func.func @_conv_relu_kernel(%arg0: i32, %arg1: i32, %arg2: memref<1x9x9x16xbf16, #tpu.memory_space<vmem>>, %arg3: memref<2x2x16x128xbf16, #tpu.memory_space<vmem>>, %arg4: memref<1x128xf32, #tpu.memory_space<vmem>>, %arg5: memref<1x4x8x128xbf16, #tpu.memory_space<vmem>>) attributes {dimension_semantics = [#tpu.dimension_semantics<parallel>, #tpu.dimension_semantics<parallel>], iteration_bounds = array<i64: 2, 2>, scalar_prefetch = 0 : i64, scratch_operands = 0 : i64, tpu.core_type = #tpu.core_type<tc>, window_params = [{transform_indices = @transform_0, window_bounds = array<i64: 1, 9, 9, 16>}, {pipeline_mode = #tpu.pipeline_mode<synchronous>, transform_indices = @transform_1, window_bounds = array<i64: 2, 2, 16, 128>}, {pipeline_mode = #tpu.pipeline_mode<synchronous>, transform_indices = @transform_2, window_bounds = array<i64: 1, 128>}, {transform_indices = @transform_3, window_bounds = array<i64: 1, 4, 8, 128>}]} {
    %c4_i32 = arith.constant 4 : i32
    %0 = arith.muli %arg1, %c4_i32 : i32
    %1 = tpu.assume_multiple %0, 4 : i32
    %cst = arith.constant 0.000000e+00 : f32
    %2 = vector.broadcast %cst : f32 to vector<32x128xf32>
    %c0_i32 = arith.constant 0 : i32
    %3 = arith.addi %1, %c0_i32 : i32
    %c0 = arith.constant 0 : index
    %4 = arith.index_cast %3 : i32 to index
    %c0_0 = arith.constant 0 : index
    %c0_1 = arith.constant 0 : index
    %5 = vector.load %arg2[%c0, %4, %c0_0, %c0_1] : memref<1x9x9x16xbf16, #tpu.memory_space<vmem>>, vector<1x4x8x16xbf16>
    %6 = vector.shape_cast %5 : vector<1x4x8x16xbf16> to vector<4x8x16xbf16>
    %7 = vector.shape_cast %6 : vector<4x8x16xbf16> to vector<32x16xbf16>
    %c0_2 = arith.constant 0 : index
    %c0_3 = arith.constant 0 : index
    %c0_4 = arith.constant 0 : index
    %c0_5 = arith.constant 0 : index
    %8 = vector.load %arg3[%c0_2, %c0_3, %c0_4, %c0_5] : memref<2x2x16x128xbf16, #tpu.memory_space<vmem>>, vector<1x1x16x128xbf16>
    %9 = vector.shape_cast %8 : vector<1x1x16x128xbf16> to vector<16x128xbf16>
    %cst_6 = arith.constant dense<0.000000e+00> : vector<32x128xf32>
    %10 = tpu.matmul %7, %9, %cst_6 {dimension_numbers = #tpu.dot_dimension_numbers<[1], [0], [0], [1], [0, 0, 1, 1], [], []>} : vector<32x16xbf16>, vector<16x128xbf16>, vector<32x128xf32> -> vector<32x128xf32>
    %11 = arith.addf %2, %10 : vector<32x128xf32>
    %c0_i32_7 = arith.constant 0 : i32
    %12 = arith.addi %1, %c0_i32_7 : i32
    %c0_8 = arith.constant 0 : index
    %13 = arith.index_cast %12 : i32 to index
    %c1 = arith.constant 1 : index
    %c0_9 = arith.constant 0 : index
    %14 = vector.load %arg2[%c0_8, %13, %c1, %c0_9] : memref<1x9x9x16xbf16, #tpu.memory_space<vmem>>, vector<1x4x8x16xbf16>
    %15 = vector.shape_cast %14 : vector<1x4x8x16xbf16> to vector<4x8x16xbf16>
    %16 = vector.shape_cast %15 : vector<4x8x16xbf16> to vector<32x16xbf16>
    %c0_10 = arith.constant 0 : index
    %c1_11 = arith.constant 1 : index
    %c0_12 = arith.constant 0 : index
    %c0_13 = arith.constant 0 : index
    %17 = vector.load %arg3[%c0_10, %c1_11, %c0_12, %c0_13] : memref<2x2x16x128xbf16, #tpu.memory_space<vmem>>, vector<1x1x16x128xbf16>
    %18 = vector.shape_cast %17 : vector<1x1x16x128xbf16> to vector<16x128xbf16>
    %cst_14 = arith.constant dense<0.000000e+00> : vector<32x128xf32>
    %19 = tpu.matmul %16, %18, %cst_14 {dimension_numbers = #tpu.dot_dimension_numbers<[1], [0], [0], [1], [0, 0, 1, 1], [], []>} : vector<32x16xbf16>, vector<16x128xbf16>, vector<32x128xf32> -> vector<32x128xf32>
    %20 = arith.addf %11, %19 : vector<32x128xf32>
    %c1_i32 = arith.constant 1 : i32
    %21 = arith.addi %1, %c1_i32 : i32
    %c0_15 = arith.constant 0 : index
    %22 = arith.index_cast %21 : i32 to index
    %c0_16 = arith.constant 0 : index
    %c0_17 = arith.constant 0 : index
    %23 = vector.load %arg2[%c0_15, %22, %c0_16, %c0_17] : memref<1x9x9x16xbf16, #tpu.memory_space<vmem>>, vector<1x4x8x16xbf16>
    %24 = vector.shape_cast %23 : vector<1x4x8x16xbf16> to vector<4x8x16xbf16>
    %25 = vector.shape_cast %24 : vector<4x8x16xbf16> to vector<32x16xbf16>
    %c1_18 = arith.constant 1 : index
    %c0_19 = arith.constant 0 : index
    %c0_20 = arith.constant 0 : index
    %c0_21 = arith.constant 0 : index
    %26 = vector.load %arg3[%c1_18, %c0_19, %c0_20, %c0_21] : memref<2x2x16x128xbf16, #tpu.memory_space<vmem>>, vector<1x1x16x128xbf16>
    %27 = vector.shape_cast %26 : vector<1x1x16x128xbf16> to vector<16x128xbf16>
    %cst_22 = arith.constant dense<0.000000e+00> : vector<32x128xf32>
    %28 = tpu.matmul %25, %27, %cst_22 {dimension_numbers = #tpu.dot_dimension_numbers<[1], [0], [0], [1], [0, 0, 1, 1], [], []>} : vector<32x16xbf16>, vector<16x128xbf16>, vector<32x128xf32> -> vector<32x128xf32>
    %29 = arith.addf %20, %28 : vector<32x128xf32>
    %c1_i32_23 = arith.constant 1 : i32
    %30 = arith.addi %1, %c1_i32_23 : i32
    %c0_24 = arith.constant 0 : index
    %31 = arith.index_cast %30 : i32 to index
    %c1_25 = arith.constant 1 : index
    %c0_26 = arith.constant 0 : index
    %32 = vector.load %arg2[%c0_24, %31, %c1_25, %c0_26] : memref<1x9x9x16xbf16, #tpu.memory_space<vmem>>, vector<1x4x8x16xbf16>
    %33 = vector.shape_cast %32 : vector<1x4x8x16xbf16> to vector<4x8x16xbf16>
    %34 = vector.shape_cast %33 : vector<4x8x16xbf16> to vector<32x16xbf16>
    %c1_27 = arith.constant 1 : index
    %c1_28 = arith.constant 1 : index
    %c0_29 = arith.constant 0 : index
    %c0_30 = arith.constant 0 : index
    %35 = vector.load %arg3[%c1_27, %c1_28, %c0_29, %c0_30] : memref<2x2x16x128xbf16, #tpu.memory_space<vmem>>, vector<1x1x16x128xbf16>
    %36 = vector.shape_cast %35 : vector<1x1x16x128xbf16> to vector<16x128xbf16>
    %cst_31 = arith.constant dense<0.000000e+00> : vector<32x128xf32>
    %37 = tpu.matmul %34, %36, %cst_31 {dimension_numbers = #tpu.dot_dimension_numbers<[1], [0], [0], [1], [0, 0, 1, 1], [], []>} : vector<32x16xbf16>, vector<16x128xbf16>, vector<32x128xf32> -> vector<32x128xf32>
    %38 = arith.addf %29, %37 : vector<32x128xf32>
    %c0_32 = arith.constant 0 : index
    %c0_33 = arith.constant 0 : index
    %39 = vector.load %arg4[%c0_32, %c0_33] : memref<1x128xf32, #tpu.memory_space<vmem>>, vector<1x128xf32>
    %40 = vector.broadcast %39 : vector<1x128xf32> to vector<32x128xf32>
    %41 = arith.addf %38, %40 : vector<32x128xf32>
    %cst_34 = arith.constant 0.000000e+00 : f32
    %42 = vector.broadcast %cst_34 : f32 to vector<32x128xf32>
    %43 = arith.maximumf %41, %42 : vector<32x128xf32>
    %44 = vector.shape_cast %43 : vector<32x128xf32> to vector<4x8x128xf32>
    %45 = arith.truncf %44 : vector<4x8x128xf32> to vector<4x8x128xbf16>
    %c0_35 = arith.constant 0 : index
    %c0_36 = arith.constant 0 : index
    %c0_37 = arith.constant 0 : index
    %c0_38 = arith.constant 0 : index
    %46 = vector.load %arg5[%c0_35, %c0_36, %c0_37, %c0_38] : memref<1x4x8x128xbf16, #tpu.memory_space<vmem>>, vector<1x4x8x128xbf16>
    %47 = vector.shape_cast %46 : vector<1x4x8x128xbf16> to vector<4x8x128xbf16>
    %48 = vector.shape_cast %45 : vector<4x8x128xbf16> to vector<1x4x8x128xbf16>
    tpu.vector_store %arg5[%c0_35, %c0_36, %c0_37, %c0_38], %48 {strides = array<i32>} : memref<1x4x8x128xbf16, #tpu.memory_space<vmem>>, vector<1x4x8x128xbf16>,
    return
  }
  func.func @transform_0(%arg0: i32, %arg1: i32) -> (i32, i32, i32, i32) {
    %c0_i32 = arith.constant 0 : i32
    %c0_i32_0 = arith.constant 0 : i32
    %c0_i32_1 = arith.constant 0 : i32
    %c0_i32_2 = arith.constant 0 : i32
    return %arg0, %c0_i32, %c0_i32_0, %c0_i32_1 : i32, i32, i32, i32
  }
  func.func @transform_1(%arg0: i32, %arg1: i32) -> (i32, i32, i32, i32) {
    %c0_i32 = arith.constant 0 : i32
    %c0_i32_0 = arith.constant 0 : i32
    %c0_i32_1 = arith.constant 0 : i32
    %c0_i32_2 = arith.constant 0 : i32
    %c0_i32_3 = arith.constant 0 : i32
    return %c0_i32, %c0_i32_0, %c0_i32_1, %c0_i32_2 : i32, i32, i32, i32
  }
  func.func @transform_2(%arg0: i32, %arg1: i32) -> (i32, i32) {
    %c0_i32 = arith.constant 0 : i32
    %c0_i32_0 = arith.constant 0 : i32
    %c0_i32_1 = arith.constant 0 : i32
    return %c0_i32, %c0_i32_0 : i32, i32
  }
  func.func @transform_3(%arg0: i32, %arg1: i32) -> (i32, i32, i32, i32) {
    %c0_i32 = arith.constant 0 : i32
    %c0_i32_0 = arith.constant 0 : i32
    %c0_i32_1 = arith.constant 0 : i32
    return %arg0, %arg1, %c0_i32, %c0_i32_0 : i32, i32, i32, i32
  }
}

module attributes {stable_mosaic.version = 11 : i64} {
  func.func @_conv_relu_kernel(%arg0: i32, %arg1: i32, %arg2: memref<1x10x10x128xbf16, #tpu.memory_space<vmem>>, %arg3: memref<3x3x128x128xbf16, #tpu.memory_space<vmem>>, %arg4: memref<1x128xf32, #tpu.memory_space<vmem>>, %arg5: memref<1x4x8x128xf32, #tpu.memory_space<vmem>>) attributes {dimension_semantics = [#tpu.dimension_semantics<parallel>, #tpu.dimension_semantics<parallel>], iteration_bounds = array<i64: 2, 2>, scalar_prefetch = 0 : i64, scratch_operands = 0 : i64, tpu.core_type = #tpu.core_type<tc>, window_params = [{transform_indices = @transform_0, window_bounds = array<i64: 1, 10, 10, 128>}, {pipeline_mode = #tpu.pipeline_mode<synchronous>, transform_indices = @transform_1, window_bounds = array<i64: 3, 3, 128, 128>}, {pipeline_mode = #tpu.pipeline_mode<synchronous>, transform_indices = @transform_2, window_bounds = array<i64: 1, 128>}, {transform_indices = @transform_3, window_bounds = array<i64: 1, 4, 8, 128>}]} {
    %c4_i32 = arith.constant 4 : i32
    %0 = arith.muli %arg1, %c4_i32 : i32
    %1 = tpu.assume_multiple %0, 4 : i32
    %cst = arith.constant 0.000000e+00 : f32
    %2 = vector.broadcast %cst : f32 to vector<32x128xf32>
    %c0_i32 = arith.constant 0 : i32
    %3 = arith.addi %1, %c0_i32 : i32
    %c0 = arith.constant 0 : index
    %4 = arith.index_cast %3 : i32 to index
    %c0_0 = arith.constant 0 : index
    %c0_1 = arith.constant 0 : index
    %5 = vector.load %arg2[%c0, %4, %c0_0, %c0_1] : memref<1x10x10x128xbf16, #tpu.memory_space<vmem>>, vector<1x4x8x128xbf16>
    %6 = vector.shape_cast %5 : vector<1x4x8x128xbf16> to vector<4x8x128xbf16>
    %7 = vector.shape_cast %6 : vector<4x8x128xbf16> to vector<32x128xbf16>
    %c0_2 = arith.constant 0 : index
    %c0_3 = arith.constant 0 : index
    %c0_4 = arith.constant 0 : index
    %c0_5 = arith.constant 0 : index
    %8 = vector.load %arg3[%c0_2, %c0_3, %c0_4, %c0_5] : memref<3x3x128x128xbf16, #tpu.memory_space<vmem>>, vector<1x1x128x128xbf16>
    %9 = vector.shape_cast %8 : vector<1x1x128x128xbf16> to vector<128x128xbf16>
    %cst_6 = arith.constant dense<0.000000e+00> : vector<32x128xf32>
    %10 = tpu.matmul %7, %9, %cst_6 {dimension_numbers = #tpu.dot_dimension_numbers<[1], [0], [0], [1], [0, 0, 1, 1], [], []>} : vector<32x128xbf16>, vector<128x128xbf16>, vector<32x128xf32> -> vector<32x128xf32>
    %11 = arith.addf %2, %10 : vector<32x128xf32>
    %c0_i32_7 = arith.constant 0 : i32
    %12 = arith.addi %1, %c0_i32_7 : i32
    %c0_8 = arith.constant 0 : index
    %13 = arith.index_cast %12 : i32 to index
    %c1 = arith.constant 1 : index
    %c0_9 = arith.constant 0 : index
    %14 = vector.load %arg2[%c0_8, %13, %c1, %c0_9] : memref<1x10x10x128xbf16, #tpu.memory_space<vmem>>, vector<1x4x8x128xbf16>
    %15 = vector.shape_cast %14 : vector<1x4x8x128xbf16> to vector<4x8x128xbf16>
    %16 = vector.shape_cast %15 : vector<4x8x128xbf16> to vector<32x128xbf16>
    %c0_10 = arith.constant 0 : index
    %c1_11 = arith.constant 1 : index
    %c0_12 = arith.constant 0 : index
    %c0_13 = arith.constant 0 : index
    %17 = vector.load %arg3[%c0_10, %c1_11, %c0_12, %c0_13] : memref<3x3x128x128xbf16, #tpu.memory_space<vmem>>, vector<1x1x128x128xbf16>
    %18 = vector.shape_cast %17 : vector<1x1x128x128xbf16> to vector<128x128xbf16>
    %cst_14 = arith.constant dense<0.000000e+00> : vector<32x128xf32>
    %19 = tpu.matmul %16, %18, %cst_14 {dimension_numbers = #tpu.dot_dimension_numbers<[1], [0], [0], [1], [0, 0, 1, 1], [], []>} : vector<32x128xbf16>, vector<128x128xbf16>, vector<32x128xf32> -> vector<32x128xf32>
    %20 = arith.addf %11, %19 : vector<32x128xf32>
    %c0_i32_15 = arith.constant 0 : i32
    %21 = arith.addi %1, %c0_i32_15 : i32
    %c0_16 = arith.constant 0 : index
    %22 = arith.index_cast %21 : i32 to index
    %c2 = arith.constant 2 : index
    %c0_17 = arith.constant 0 : index
    %23 = vector.load %arg2[%c0_16, %22, %c2, %c0_17] : memref<1x10x10x128xbf16, #tpu.memory_space<vmem>>, vector<1x4x8x128xbf16>
    %24 = vector.shape_cast %23 : vector<1x4x8x128xbf16> to vector<4x8x128xbf16>
    %25 = vector.shape_cast %24 : vector<4x8x128xbf16> to vector<32x128xbf16>
    %c0_18 = arith.constant 0 : index
    %c2_19 = arith.constant 2 : index
    %c0_20 = arith.constant 0 : index
    %c0_21 = arith.constant 0 : index
    %26 = vector.load %arg3[%c0_18, %c2_19, %c0_20, %c0_21] : memref<3x3x128x128xbf16, #tpu.memory_space<vmem>>, vector<1x1x128x128xbf16>
    %27 = vector.shape_cast %26 : vector<1x1x128x128xbf16> to vector<128x128xbf16>
    %cst_22 = arith.constant dense<0.000000e+00> : vector<32x128xf32>
    %28 = tpu.matmul %25, %27, %cst_22 {dimension_numbers = #tpu.dot_dimension_numbers<[1], [0], [0], [1], [0, 0, 1, 1], [], []>} : vector<32x128xbf16>, vector<128x128xbf16>, vector<32x128xf32> -> vector<32x128xf32>
    %29 = arith.addf %20, %28 : vector<32x128xf32>
    %c1_i32 = arith.constant 1 : i32
    %30 = arith.addi %1, %c1_i32 : i32
    %c0_23 = arith.constant 0 : index
    %31 = arith.index_cast %30 : i32 to index
    %c0_24 = arith.constant 0 : index
    %c0_25 = arith.constant 0 : index
    %32 = vector.load %arg2[%c0_23, %31, %c0_24, %c0_25] : memref<1x10x10x128xbf16, #tpu.memory_space<vmem>>, vector<1x4x8x128xbf16>
    %33 = vector.shape_cast %32 : vector<1x4x8x128xbf16> to vector<4x8x128xbf16>
    %34 = vector.shape_cast %33 : vector<4x8x128xbf16> to vector<32x128xbf16>
    %c1_26 = arith.constant 1 : index
    %c0_27 = arith.constant 0 : index
    %c0_28 = arith.constant 0 : index
    %c0_29 = arith.constant 0 : index
    %35 = vector.load %arg3[%c1_26, %c0_27, %c0_28, %c0_29] : memref<3x3x128x128xbf16, #tpu.memory_space<vmem>>, vector<1x1x128x128xbf16>
    %36 = vector.shape_cast %35 : vector<1x1x128x128xbf16> to vector<128x128xbf16>
    %cst_30 = arith.constant dense<0.000000e+00> : vector<32x128xf32>
    %37 = tpu.matmul %34, %36, %cst_30 {dimension_numbers = #tpu.dot_dimension_numbers<[1], [0], [0], [1], [0, 0, 1, 1], [], []>} : vector<32x128xbf16>, vector<128x128xbf16>, vector<32x128xf32> -> vector<32x128xf32>
    %38 = arith.addf %29, %37 : vector<32x128xf32>
    %c1_i32_31 = arith.constant 1 : i32
    %39 = arith.addi %1, %c1_i32_31 : i32
    %c0_32 = arith.constant 0 : index
    %40 = arith.index_cast %39 : i32 to index
    %c1_33 = arith.constant 1 : index
    %c0_34 = arith.constant 0 : index
    %41 = vector.load %arg2[%c0_32, %40, %c1_33, %c0_34] : memref<1x10x10x128xbf16, #tpu.memory_space<vmem>>, vector<1x4x8x128xbf16>
    %42 = vector.shape_cast %41 : vector<1x4x8x128xbf16> to vector<4x8x128xbf16>
    %43 = vector.shape_cast %42 : vector<4x8x128xbf16> to vector<32x128xbf16>
    %c1_35 = arith.constant 1 : index
    %c1_36 = arith.constant 1 : index
    %c0_37 = arith.constant 0 : index
    %c0_38 = arith.constant 0 : index
    %44 = vector.load %arg3[%c1_35, %c1_36, %c0_37, %c0_38] : memref<3x3x128x128xbf16, #tpu.memory_space<vmem>>, vector<1x1x128x128xbf16>
    %45 = vector.shape_cast %44 : vector<1x1x128x128xbf16> to vector<128x128xbf16>
    %cst_39 = arith.constant dense<0.000000e+00> : vector<32x128xf32>
    %46 = tpu.matmul %43, %45, %cst_39 {dimension_numbers = #tpu.dot_dimension_numbers<[1], [0], [0], [1], [0, 0, 1, 1], [], []>} : vector<32x128xbf16>, vector<128x128xbf16>, vector<32x128xf32> -> vector<32x128xf32>
    %47 = arith.addf %38, %46 : vector<32x128xf32>
    %c1_i32_40 = arith.constant 1 : i32
    %48 = arith.addi %1, %c1_i32_40 : i32
    %c0_41 = arith.constant 0 : index
    %49 = arith.index_cast %48 : i32 to index
    %c2_42 = arith.constant 2 : index
    %c0_43 = arith.constant 0 : index
    %50 = vector.load %arg2[%c0_41, %49, %c2_42, %c0_43] : memref<1x10x10x128xbf16, #tpu.memory_space<vmem>>, vector<1x4x8x128xbf16>
    %51 = vector.shape_cast %50 : vector<1x4x8x128xbf16> to vector<4x8x128xbf16>
    %52 = vector.shape_cast %51 : vector<4x8x128xbf16> to vector<32x128xbf16>
    %c1_44 = arith.constant 1 : index
    %c2_45 = arith.constant 2 : index
    %c0_46 = arith.constant 0 : index
    %c0_47 = arith.constant 0 : index
    %53 = vector.load %arg3[%c1_44, %c2_45, %c0_46, %c0_47] : memref<3x3x128x128xbf16, #tpu.memory_space<vmem>>, vector<1x1x128x128xbf16>
    %54 = vector.shape_cast %53 : vector<1x1x128x128xbf16> to vector<128x128xbf16>
    %cst_48 = arith.constant dense<0.000000e+00> : vector<32x128xf32>
    %55 = tpu.matmul %52, %54, %cst_48 {dimension_numbers = #tpu.dot_dimension_numbers<[1], [0], [0], [1], [0, 0, 1, 1], [], []>} : vector<32x128xbf16>, vector<128x128xbf16>, vector<32x128xf32> -> vector<32x128xf32>
    %56 = arith.addf %47, %55 : vector<32x128xf32>
    %c2_i32 = arith.constant 2 : i32
    %57 = arith.addi %1, %c2_i32 : i32
    %c0_49 = arith.constant 0 : index
    %58 = arith.index_cast %57 : i32 to index
    %c0_50 = arith.constant 0 : index
    %c0_51 = arith.constant 0 : index
    %59 = vector.load %arg2[%c0_49, %58, %c0_50, %c0_51] : memref<1x10x10x128xbf16, #tpu.memory_space<vmem>>, vector<1x4x8x128xbf16>
    %60 = vector.shape_cast %59 : vector<1x4x8x128xbf16> to vector<4x8x128xbf16>
    %61 = vector.shape_cast %60 : vector<4x8x128xbf16> to vector<32x128xbf16>
    %c2_52 = arith.constant 2 : index
    %c0_53 = arith.constant 0 : index
    %c0_54 = arith.constant 0 : index
    %c0_55 = arith.constant 0 : index
    %62 = vector.load %arg3[%c2_52, %c0_53, %c0_54, %c0_55] : memref<3x3x128x128xbf16, #tpu.memory_space<vmem>>, vector<1x1x128x128xbf16>
    %63 = vector.shape_cast %62 : vector<1x1x128x128xbf16> to vector<128x128xbf16>
    %cst_56 = arith.constant dense<0.000000e+00> : vector<32x128xf32>
    %64 = tpu.matmul %61, %63, %cst_56 {dimension_numbers = #tpu.dot_dimension_numbers<[1], [0], [0], [1], [0, 0, 1, 1], [], []>} : vector<32x128xbf16>, vector<128x128xbf16>, vector<32x128xf32> -> vector<32x128xf32>
    %65 = arith.addf %56, %64 : vector<32x128xf32>
    %c2_i32_57 = arith.constant 2 : i32
    %66 = arith.addi %1, %c2_i32_57 : i32
    %c0_58 = arith.constant 0 : index
    %67 = arith.index_cast %66 : i32 to index
    %c1_59 = arith.constant 1 : index
    %c0_60 = arith.constant 0 : index
    %68 = vector.load %arg2[%c0_58, %67, %c1_59, %c0_60] : memref<1x10x10x128xbf16, #tpu.memory_space<vmem>>, vector<1x4x8x128xbf16>
    %69 = vector.shape_cast %68 : vector<1x4x8x128xbf16> to vector<4x8x128xbf16>
    %70 = vector.shape_cast %69 : vector<4x8x128xbf16> to vector<32x128xbf16>
    %c2_61 = arith.constant 2 : index
    %c1_62 = arith.constant 1 : index
    %c0_63 = arith.constant 0 : index
    %c0_64 = arith.constant 0 : index
    %71 = vector.load %arg3[%c2_61, %c1_62, %c0_63, %c0_64] : memref<3x3x128x128xbf16, #tpu.memory_space<vmem>>, vector<1x1x128x128xbf16>
    %72 = vector.shape_cast %71 : vector<1x1x128x128xbf16> to vector<128x128xbf16>
    %cst_65 = arith.constant dense<0.000000e+00> : vector<32x128xf32>
    %73 = tpu.matmul %70, %72, %cst_65 {dimension_numbers = #tpu.dot_dimension_numbers<[1], [0], [0], [1], [0, 0, 1, 1], [], []>} : vector<32x128xbf16>, vector<128x128xbf16>, vector<32x128xf32> -> vector<32x128xf32>
    %74 = arith.addf %65, %73 : vector<32x128xf32>
    %c2_i32_66 = arith.constant 2 : i32
    %75 = arith.addi %1, %c2_i32_66 : i32
    %c0_67 = arith.constant 0 : index
    %76 = arith.index_cast %75 : i32 to index
    %c2_68 = arith.constant 2 : index
    %c0_69 = arith.constant 0 : index
    %77 = vector.load %arg2[%c0_67, %76, %c2_68, %c0_69] : memref<1x10x10x128xbf16, #tpu.memory_space<vmem>>, vector<1x4x8x128xbf16>
    %78 = vector.shape_cast %77 : vector<1x4x8x128xbf16> to vector<4x8x128xbf16>
    %79 = vector.shape_cast %78 : vector<4x8x128xbf16> to vector<32x128xbf16>
    %c2_70 = arith.constant 2 : index
    %c2_71 = arith.constant 2 : index
    %c0_72 = arith.constant 0 : index
    %c0_73 = arith.constant 0 : index
    %80 = vector.load %arg3[%c2_70, %c2_71, %c0_72, %c0_73] : memref<3x3x128x128xbf16, #tpu.memory_space<vmem>>, vector<1x1x128x128xbf16>
    %81 = vector.shape_cast %80 : vector<1x1x128x128xbf16> to vector<128x128xbf16>
    %cst_74 = arith.constant dense<0.000000e+00> : vector<32x128xf32>
    %82 = tpu.matmul %79, %81, %cst_74 {dimension_numbers = #tpu.dot_dimension_numbers<[1], [0], [0], [1], [0, 0, 1, 1], [], []>} : vector<32x128xbf16>, vector<128x128xbf16>, vector<32x128xf32> -> vector<32x128xf32>
    %83 = arith.addf %74, %82 : vector<32x128xf32>
    %c0_75 = arith.constant 0 : index
    %c0_76 = arith.constant 0 : index
    %84 = vector.load %arg4[%c0_75, %c0_76] : memref<1x128xf32, #tpu.memory_space<vmem>>, vector<1x128xf32>
    %85 = vector.broadcast %84 : vector<1x128xf32> to vector<32x128xf32>
    %86 = arith.addf %83, %85 : vector<32x128xf32>
    %cst_77 = arith.constant 0.000000e+00 : f32
    %87 = vector.broadcast %cst_77 : f32 to vector<32x128xf32>
    %88 = arith.maximumf %86, %87 : vector<32x128xf32>
    %89 = vector.shape_cast %88 : vector<32x128xf32> to vector<4x8x128xf32>
    %c0_78 = arith.constant 0 : index
    %c0_79 = arith.constant 0 : index
    %c0_80 = arith.constant 0 : index
    %c0_81 = arith.constant 0 : index
    %90 = vector.load %arg5[%c0_78, %c0_79, %c0_80, %c0_81] : memref<1x4x8x128xf32, #tpu.memory_space<vmem>>, vector<1x4x8x128xf32>
    %91 = vector.shape_cast %90 : vector<1x4x8x128xf32> to vector<4x8x128xf32>
    %92 = vector.shape_cast %89 : vector<4x8x128xf32> to vector<1x4x8x128xf32>
    tpu.vector_store %arg5[%c0_78, %c0_79, %c0_80, %c0_81], %92 {strides = array<i32>} : memref<1x4x8x128xf32, #tpu.memory_space<vmem>>, vector<1x4x8x128xf32>,
    return
  }
  func.func @transform_0(%arg0: i32, %arg1: i32) -> (i32, i32, i32, i32) {
    %c0_i32 = arith.constant 0 : i32
    %c0_i32_0 = arith.constant 0 : i32
    %c0_i32_1 = arith.constant 0 : i32
    %c0_i32_2 = arith.constant 0 : i32
    return %arg0, %c0_i32, %c0_i32_0, %c0_i32_1 : i32, i32, i32, i32
  }
  func.func @transform_1(%arg0: i32, %arg1: i32) -> (i32, i32, i32, i32) {
    %c0_i32 = arith.constant 0 : i32
    %c0_i32_0 = arith.constant 0 : i32
    %c0_i32_1 = arith.constant 0 : i32
    %c0_i32_2 = arith.constant 0 : i32
    %c0_i32_3 = arith.constant 0 : i32
    return %c0_i32, %c0_i32_0, %c0_i32_1, %c0_i32_2 : i32, i32, i32, i32
  }
  func.func @transform_2(%arg0: i32, %arg1: i32) -> (i32, i32) {
    %c0_i32 = arith.constant 0 : i32
    %c0_i32_0 = arith.constant 0 : i32
    %c0_i32_1 = arith.constant 0 : i32
    return %c0_i32, %c0_i32_0 : i32, i32
  }
  func.func @transform_3(%arg0: i32, %arg1: i32) -> (i32, i32, i32, i32) {
    %c0_i32 = arith.constant 0 : i32
    %c0_i32_0 = arith.constant 0 : i32
    %c0_i32_1 = arith.constant 0 : i32
    return %arg0, %arg1, %c0_i32, %c0_i32_0 : i32, i32, i32, i32
  }
}

</mosaic_0001>

<bundles_post_ra>
// kernel: vggnet_forward.2
= control target key start
LH: loop header
LB: loop body
LE: loop exit
PB: predicated region body
PF: predicated region fallthrough
CT: control target
= control target key end

     0   :  { %s973_s12 = smov 0   ;;  %s975_s13 = smov 0   ;;  %s1121_s0 = inlined_call_operand.vmem [shape: bf16[2,9,9,16], index: 0, kind: input, shape index: {}]   ;;  %s1122_s1 = inlined_call_operand.vmem [shape: bf16[2,2,16,128], index: 1, kind: input, shape index: {}]   ;;  %s1123_s2 = inlined_call_operand.vmem [shape: f32[1,128], index: 2, kind: input, shape index: {}]   ;;  %s1124_s3 = inlined_call_operand.vmem [shape: bf16[2,8,8,128], index: 3, kind: output, shape index: {}]  }
   0x1   :  { %s977_s14 = smov 0   ;;  %s979_s15 = smov 0  }
   0x2   :  { %s981_s16 = smov 0  }
   0x3 LB: > { %s22_s17 = sadd.s32 1, %s943_s14  ;;  %s25_s18 = sadd.s32 1, %s947_s15  ;;  %s951_s16 = sphi %s981_s16, %s13_s16   ;;  %s947_s15 = sphi %s979_s15, %s1130_s15   ;;  %s943_s14 = sphi %s977_s14, %s1129_s14   ;;  %s939_s13 = sphi %s975_s13, %s1128_s13   ;;  %s935_s12 = sphi %s973_s12, %s1127_s12  }
   0x4   : > { %p23_p0 = scmp.ge.s32.totalorder %s22_s17, 2  ;;  %p751_p1 = scmp.ge.s32.totalorder %s951_s16, 1 }
   0x5   : > { %p151_p2 = scmp.lt.s32.totalorder %s951_s16, 5 }
   0x6   : > { %s1132_s17 = smov (%p23_p0, %s22_s17), 0  ;;  %s1134_s18 = smov (!%p23_p0, %s25_s18), %s947_s15 }
   0x7   : > { %p152_p3 = pnand %p751_p1, %p151_p2  ;;  %p27_p4 = scmp.ge.s32.totalorder %s1134_s18, 2 }
   0x8   : > { %v905_v0 = vld [vmem:[%s1122_s1 + $0x10] sm:$0xff] (!%p152_p3)   ;;  %p179_p5 = scmp.lt.s32.totalorder (!%p152_p3), %s939_s13, 1  ;;  %v908_v1 = vld [vmem:[%s1122_s1 + $0x8] sm:$0xff] (!%p152_p3)   ;;  %s803_s23 = sshll.u32 (!%p152_p3), %s935_s12, 5  ;;  %v1018_v2 = vld [vmem:[%s1122_s1] sm:$0xff] (!%p152_p3)   ;;  %vm283_vm0 = vcmask (!%p152_p3), 130048  }
   0x9   : > { %s1136_s18 = smov (%p27_p4, %s1134_s18), 0  ;;  %155 = sbr.rel (%p152_p3) target bundleno = 274 (0x112), region = 32 }
   0xa   : > { %840 = vmatprep.subr.bf16.mxu0 (!%p152_p3), %v905_v0  ;;  %828 = vmatprep.subr.bf16.mxu1 (!%p152_p3), %v908_v1  ;;  %v910_v3 = vld [vmem:[%s1122_s1 + $0x18] sm:$0xff] (!%p152_p3)   ;;  %vm209_vm1 = vsmask.f32 (!%p152_p3), 3328  ;;  %vm210_vm2 = vsmask.f32 (!%p152_p3), 7440  ;;  %s753_s6 = sshll.u32 (!%p152_p3), %s935_s12, 2 }
   0xb   : > { %841 = vmatpush3.bf16.msra.mxu0 (!%p152_p3), %v905_v0  ;;  %829 = vmatpush3.bf16.msra.mxu1 (!%p152_p3), %v908_v1  ;;  %vm1060_vm3 = vmor (!%p152_p3), %vm209_vm1, %vm210_vm2  ;;  %p187_p6 = scmp.lt.s32.totalorder (!%p152_p3), %s753_s6, 7  ;;  %v799_v33 = vld [vmem:[%s1123_s2] ss:$0 sm:$0xff] (!%p152_p3) }
   0xc   : > { %834 = vmatprep.subr.bf16.mxu1 (!%p152_p3), %v1018_v2  ;;  %846 = vmatprep.subr.bf16.mxu0 (!%p152_p3), %v910_v3 }
  0x10   : > { %s1138_s13 = smov (!%p179_p5, %s939_s13), 1  ;;  %s1140_s6 = smov (!%p187_p6, %s753_s6), 7 }
  0x11   : > { %s864_s24 = smul.u32 72, %s1138_s13  ;;  %s754_s7 = sshll.u32 %s1138_s13, 3 }
  0x12   : > { %s190_s10 = sadd.s32 %s754_s7, %s1140_s6 }
  0x13   : > { %s183_s4 = scalar_lea.vmem %s1121_s0, %s864_s24  ;;  %s755_s11 = sshll.u32 %s190_s10, 2 }
  0x14   : > { %s1027_s5 = scalar_lea.vmem %s183_s4, %s803_s23  ;;  %s192_s19 = scalar_lea.vmem %s1124_s3, %s755_s11 }
  0x15   : > { %v906_v4 = vld [vmem:[%s1027_s5 + $0x8] ss:$8 sps:$4 sm:$0xff]   ;;  %v907_v5 = vld [vmem:[%s1027_s5 + $0x18] ss:$8 sps:$4 sm:$0xff]   ;;  %v205_v8 = vld [vmem:[%s1027_s5 + $0x4] sm:$0x1] }
  0x16   : > { %842 = vmatprep.mubr.msk.bf16.mxu0 %vm283_vm0, %v906_v4  ;;  %v1033_v6 = vld [vmem:[%s1027_s5] sm:$0xf]  ;;  %v1036_v7 = vld [vmem:[%s1027_s5 + $0x8] sm:$0xf]  ;;  %v206_v9 = vld [vmem:[%s1027_s5 + $0xc] sm:$0x1] }
  0x17   : > { %843 = vmatmul.mubr.msk.bf16.vlgmr.msra.gmra.mrb[0].mxu0 %vm283_vm0, %v907_v5  ;;  %v213_v10 = vshrl.u32 %v1033_v6, 16  ;;  %v216_v11 = vshll.u32 %v1033_v6, 16  ;;  %v222_v12 = vshll.u32 %v205_v8, 16  ;;  %v227_v13 = vshrl.u32 %v1036_v7, 16  ;;  %v1046_v16 = vld [vmem:[%s1027_s5 + $0x10] sm:$0xf] }
  0x18   : > { %v230_v14 = vshll.u32 %v1036_v7, 16  ;;  %v236_v15 = vshll.u32 %v206_v9, 16  ;;  %v1049_v17 = vld [vmem:[%s1027_s5 + $0x18] sm:$0xf]  ;;  %847 = vmatpush3.bf16.msra.mxu0 %v910_v3  ;;  %v207_v22 = vld [vmem:[%s1027_s5 + $0x14] sm:$0x1]  ;;  %v766_v62 = vcombine.low %v1033_v6, %v1036_v7 }
  0x19   : > { %v215_v18 = vrot.slane %v213_v10, 4  ;;  %v218_v19 = vrot.slane %v216_v11, 5  ;;  %v224_v20 = vrot.slane %v222_v12, 5  ;;  %v229_v21 = vrot.slane %v227_v13, 4  ;;  %v208_v25 = vld [vmem:[%s1027_s5 + $0x1c] sm:$0x1] }
  0x1a   : > { %v232_v23 = vrot.slane %v230_v14, 5  ;;  %v238_v24 = vrot.slane %v236_v15, 5  ;;  %v241_v26 = vshrl.u32 %v1046_v16, 16  ;;  %v244_v27 = vshll.u32 %v1046_v16, 16  ;;  %v784_v32 = vld [vmem:[%s1027_s5 + $0x8] sm:$0xf] }
  0x1b   : > { %v219_v28 = vor.u32 %v218_v19, %v215_v18  ;;  %v250_v29 = vshll.u32 %v207_v22, 16  ;;  %v255_v30 = vshrl.u32 %v1049_v17, 16  ;;  %v258_v31 = vshll.u32 %v1049_v17, 16  ;;  %v785_v38 = vld [vmem:[%s1027_s5 + $0xc] sm:$0x1] }
  0x1c   : > { %v233_v34 = vor.u32 %v232_v23, %v229_v21  ;;  %v243_v35 = vrot.slane %v241_v26, 4  ;;  %v246_v36 = vrot.slane %v244_v27, 5  ;;  %v264_v37 = vshll.u32 %v208_v25, 16  ;;  %v786_v43 = vld [vmem:[%s1027_s5 + $0x10] sm:$0xf] }
  0x1d   : > { %v220_v39 = vrot.slane %v219_v28, 4  ;;  %v252_v40 = vrot.slane %v250_v29, 5  ;;  %v257_v41 = vrot.slane %v255_v30, 4  ;;  %v260_v42 = vrot.slane %v258_v31, 5  ;;  %v787_v50 = vld [vmem:[%s1027_s5 + $0x14] sm:$0x1] }
  0x1e   : > { %v234_v44 = vrot.slane %v233_v34, 4  ;;  %v247_v45 = vor.u32 %v246_v36, %v243_v35  ;;  %v266_v46 = vrot.slane %v264_v37, 5  ;;  %v505_v47 = vshrl.u32 %v784_v32, 16  ;;  %v788_v57 = vld [vmem:[%s1027_s5 + $0x18] sm:$0xf] }
  0x1f   : > { %v225_v48 = vsel %vm1060_vm3, %v220_v39, %v224_v20  ;;  %v261_v49 = vor.u32 %v260_v42, %v257_v41  ;;  %v508_v51 = vshll.u32 %v784_v32, 16  ;;  %v514_v52 = vshll.u32 %v785_v38, 16  ;;  %v789_v61 = vld [vmem:[%s1027_s5 + $0x1c] sm:$0x1]  ;;  %v790_v4 = vld [vmem:[%s1027_s5 + $0x20] sm:$0xf] }
  0x20   : > { %v239_v53 = vsel %vm1060_vm3, %v234_v44, %v238_v24  ;;  %v248_v54 = vrot.slane %v247_v45, 4  ;;  %v507_v55 = vrot.slane %v505_v47, 4  ;;  %v519_v56 = vshrl.u32 %v786_v43, 16  ;;  %v791_v9 = vld [vmem:[%s1027_s5 + $0x24] sm:$0x1] }
  0x21   : > { %v761_v58 = vcombine.low %v225_v48, %v239_v53  ;;  %v262_v59 = vrot.slane %v261_v49, 4  ;;  %v510_v60 = vrot.slane %v508_v51, 5  ;;  %v522_v1 = vshll.u32 %v786_v43, 16 }
  0x22   : > { %v253_v63 = vsel %vm1060_vm3, %v248_v54, %v252_v40  ;;  %v521_v0 = vrot.slane %v519_v56, 4  ;;  %v528_v3 = vshll.u32 %v787_v50, 16  ;;  %v533_v10 = vshrl.u32 %v788_v57, 16 }
  0x23   : > { %830 = vmatprep.mubr.msk.bf16.mxu1 %vm283_vm0, %v761_v58  ;;  %v267_v5 = vsel %vm1060_vm3, %v262_v59, %v266_v46  ;;  %v511_v8 = vor.u32 %v510_v60, %v507_v55  ;;  %v536_v11 = vshll.u32 %v788_v57, 16  ;;  %v516_v13 = vrot.slane %v514_v52, 5 }
  0x24   : > { %v762_v12 = vcombine.low %v253_v63, %v267_v5  ;;  %v524_v14 = vrot.slane %v522_v1, 5  ;;  %v542_v6 = vshll.u32 %v789_v61, 16  ;;  %v535_v15 = vrot.slane %v533_v10, 4 }
  0x25   : > { %v512_v7 = vrot.slane %v511_v8, 4  ;;  %v538_v18 = vrot.slane %v536_v11, 5  ;;  %v547_v19 = vshrl.u32 %v790_v4, 16  ;;  %v530_v21 = vrot.slane %v528_v3, 5 }
  0x26   : > { %831 = vmatmul.mubr.msk.bf16.vlgmr.msra.gmra.mrb[0].mxu1 %vm283_vm0, %v762_v12  ;;  %v525_v20 = vor.u32 %v524_v14, %v521_v0  ;;  %v550_v22 = vshll.u32 %v790_v4, 16  ;;  %v556_v23 = vshll.u32 %v791_v9, 16  ;;  %v544_v28 = vrot.slane %v542_v6, 5 }
  0x27   : > { %835 = vmatpush3.bf16.msra.mxu1 %v1018_v2  ;;  %v539_v24 = vor.u32 %v538_v18, %v535_v15  ;;  %v549_v25 = vrot.slane %v547_v19, 4  ;;  %836 = vmatprep.mubr.msk.bf16.mxu1 %vm283_vm0, %v766_v62  ;;  %v517_v26 = vsel %vm1060_vm3, %v512_v7, %v516_v13  ;;  %v767_v38 = vcombine.low %v1046_v16, %v1049_v17 }
  0x28   : > { %v526_v27 = vrot.slane %v525_v20, 4  ;;  %v552_v29 = vrot.slane %v550_v22, 5  ;;  %v558_v34 = vrot.slane %v556_v23, 5 }
  0x29   : > { %v540_v30 = vrot.slane %v539_v24, 4 }
  0x2a   : > { %v531_v31 = vsel %vm1060_vm3, %v526_v27, %v530_v21  ;;  %v553_v32 = vor.u32 %v552_v29, %v549_v25 }
  0x2b   : > { %v794_v35 = vcombine.low %v517_v26, %v531_v31  ;;  %v545_v2 = vsel %vm1060_vm3, %v540_v30, %v544_v28 }
  0x2c   : > { %v554_v36 = vrot.slane %v553_v32, 4 }
  0x2d   : > { %848 = vmatprep.mubr.msk.bf16.mxu0 %vm283_vm0, %v794_v35 }
  0x2e   : > { %v559_v37 = vsel %vm1060_vm3, %v554_v36, %v558_v34 }
  0x2f   : > { %v795_v39 = vcombine.low %v545_v2, %v559_v37 }
  0x31   : > { %849 = vmatmul.mubr.msk.bf16.vlgmr.msra.gmra.mrb[0].mxu0 %vm283_vm0, %v795_v39 }
  0x32   : > { %837 = vmatmul.mubr.msk.bf16.vlgmr.msra.gmra.mrb[0].mxu1 %vm283_vm0, %v767_v38 }
 0x104   : > { %v850_v40 = vpop.f32.mrb[0].mxu0 }
 0x105   : > { %v615_v41 = vpop.f32.mrb[1].mxu0  ;;  %v838_v42 = vpop.f32.mrb[0].mxu1 }
 0x106   : > { %v851_v43 = vpop.f32.mrb[2].mxu0  ;;  %v852_v44 = vadd.f32 %v850_v40, %v838_v42  ;;  %v395_v45 = vpop.f32.mrb[1].mxu1 }
 0x107   : > { %v618_v16 = vpop.f32.mrb[3].mxu0  ;;  %v853_v17 = vadd.f32 %v615_v41, %v395_v45  ;;  %v839_v46 = vpop.f32.mrb[2].mxu1 }
 0x108   : > { %v643_v47 = vadd.f32 %v852_v44, %v799_v33  ;;  %v854_v48 = vadd.f32 %v851_v43, %v839_v46  ;;  %v398_v49 = vpop.f32.mrb[3].mxu1 }
 0x109   : > { %v641_v50 = vadd.f32 %v853_v17, %v799_v33  ;;  %v855_v51 = vadd.f32 %v618_v16, %v398_v49 }
 0x10a   : > { %v644_v52 = vadd.f32 %v854_v48, %v799_v33  ;;  %v647_v54 = vmax.f32 %v643_v47, 0.0 }
 0x10b   : > { %v642_v53 = vadd.f32 %v855_v51, %v799_v33  ;;  %v645_v56 = vmax.f32 %v641_v50, 0.0 }
 0x10c   : > { %v648_v55 = vmax.f32 %v644_v52, 0.0 }
 0x10d   : > { %v646_v57 = vmax.f32 %v642_v53, 0.0 }
 0x10e   : > { %v813_v58 = vpack.c.bf16 %v648_v55, %v647_v54 }
 0x10f   : > { %v808_v59 = vpack.c.bf16 %v646_v57, %v645_v56 }
 0x110   : > { %815 = vst [vmem:[%s192_s19 + $0x8] sm:$0xff] %v813_v58  }
 0x111   : > { %809 = vst [vmem:[%s192_s19] sm:$0xff] %v808_v59  }
 0x112 PF: > { %s13_s16 = sadd.s32 1, %s951_s16   ;;  %s1127_s12 = smov %s943_s14 }
 0x113   : > { %p10_p7 = scmp.ge.s32.totalorder %s13_s16, 6   ;;  %s1128_s13 = smov %s947_s15 }
 0x114   : > { %s1129_s14 = smov %s1132_s17  ;;  %s1130_s15 = smov %s1136_s18 }
 0x115   :  { %12 = sbr.rel (!%p10_p7) target bundleno = 3 (0x3), region = 67 }

// kernel: vggnet_forward.3
= control target key start
LH: loop header
LB: loop body
LE: loop exit
PB: predicated region body
PF: predicated region fallthrough
CT: control target
= control target key end

     0   :  { %s2513_s12 = smov 0   ;;  %s2515_s13 = smov 0   ;;  %s2972_s0 = inlined_call_operand.vmem [shape: bf16[2,10,10,128], index: 0, kind: input, shape index: {}]   ;;  %s2973_s1 = inlined_call_operand.vmem [shape: bf16[3,3,128,128], index: 1, kind: input, shape index: {}]   ;;  %s2974_s2 = inlined_call_operand.vmem [shape: f32[1,128], index: 2, kind: input, shape index: {}]   ;;  %s2975_s3 = inlined_call_operand.vmem [shape: f32[2,8,8,128], index: 3, kind: output, shape index: {}]  }
   0x1   :  { %s2517_s14 = smov 0   ;;  %s2519_s15 = smov 0  }
   0x2   :  { %s2521_s16 = smov 0  }
   0x3 LB: > { %s22_s17 = sadd.s32 1, %s2483_s14  ;;  %s25_s18 = sadd.s32 1, %s2487_s15  ;;  %s2491_s16 = sphi %s2521_s16, %s13_s16   ;;  %s2487_s15 = sphi %s2519_s15, %s2983_s15   ;;  %s2483_s14 = sphi %s2517_s14, %s2982_s14   ;;  %s2479_s13 = sphi %s2515_s13, %s2981_s13   ;;  %s2475_s12 = sphi %s2513_s12, %s2980_s12  }
   0x4   : > { %p23_p0 = scmp.ge.s32.totalorder %s22_s17, 2  ;;  %p1751_p1 = scmp.ge.s32.totalorder %s2491_s16, 1 }
   0x5   : > { %p151_p2 = scmp.lt.s32.totalorder %s2491_s16, 5 }
   0x6   : > { %s2985_s17 = smov (%p23_p0, %s22_s17), 0  ;;  %s2987_s18 = smov (!%p23_p0, %s25_s18), %s2487_s15 }
   0x7   : > { %p152_p3 = pnand %p1751_p1, %p151_p2  ;;  %p27_p4 = scmp.ge.s32.totalorder %s2987_s18, 2 }
   0x8   : > { %v2375_v0 = vld [vmem:[%s2973_s1 + $0x40] sm:$0xff] (!%p152_p3)   ;;  %p179_p5 = scmp.lt.s32.totalorder (!%p152_p3), %s2479_s13, 1  ;;  %v2377_v2 = vld [vmem:[%s2973_s1 + $0x48] sm:$0xff] (!%p152_p3)   ;;  %v2379_v4 = vld [vmem:[%s2973_s1 + $0x50] sm:$0xff] (!%p152_p3)   ;;  %s2029_s19 = sshll.u32 (!%p152_p3), %s2475_s12, 5  ;;  %vm525_vm3 = vcmask (!%p152_p3), 1042432  }
   0x9   : > { %s2989_s18 = smov (%p27_p4, %s2987_s18), 0  ;;  %155 = sbr.rel (%p152_p3) target bundleno = 398 (0x18e), region = 32 }
   0xa   : > { %v2376_v1 = vld [vmem:[%s2973_s1 + $0x100] sm:$0xff] (!%p152_p3)   ;;  %2122 = vmatprep.subr.bf16.mxu1 (!%p152_p3), %v2375_v0  ;;  %v2378_v3 = vld [vmem:[%s2973_s1 + $0x108] sm:$0xff] (!%p152_p3)   ;;  %v2380_v5 = vld [vmem:[%s2973_s1 + $0x110] sm:$0xff] (!%p152_p3)   ;;  %vm223_vm0 = vsmask.f32 (!%p152_p3), 3328  ;;  %vm526_vm4 = vcmask (!%p152_p3), 1046532  }
   0xb   : > { %2202 = vmatprep.subr.bf16.mxu0 (!%p152_p3), %v2376_v1  ;;  %2123 = vmatpush3.bf16.msra.mxu1 (!%p152_p3), %v2375_v0  ;;  %v2381_v6 = vld [vmem:[%s2973_s1 + $0x58] sm:$0xff] (!%p152_p3)   ;;  %v2383_v8 = vld [vmem:[%s2973_s1 + $0x60] sm:$0xff] (!%p152_p3)   ;;  %v2385_v10 = vld [vmem:[%s2973_s1 + $0x68] sm:$0xff] (!%p152_p3)   ;;  %vm224_vm1 = vsmask.f32 (!%p152_p3), 7440 }
   0xc   : > { %2203 = vmatpush3.bf16.msra.mxu0 (!%p152_p3), %v2376_v1  ;;  %2124 = vmatprep.subr.bf16.mxu1 (!%p152_p3), %v2377_v2  ;;  %v2382_v7 = vld [vmem:[%s2973_s1 + $0x118] sm:$0xff] (!%p152_p3)   ;;  %v2384_v9 = vld [vmem:[%s2973_s1 + $0x120] sm:$0xff] (!%p152_p3)   ;;  %v2386_v14 = vld [vmem:[%s2973_s1 + $0x128] sm:$0xff] (!%p152_p3)  }
   0xd   : > { %2204 = vmatprep.subr.bf16.mxu0 (!%p152_p3), %v2378_v3  ;;  %v2387_v22 = vld [vmem:[%s2973_s1 + $0x70] sm:$0xff] (!%p152_p3)   ;;  %v2389_v37 = vld [vmem:[%s2973_s1 + $0x78] sm:$0xff] (!%p152_p3)   ;;  %vm2627_vm2 = vmor (!%p152_p3), %vm223_vm0, %vm224_vm1 }
   0xe   : > { %v2388_v23 = vld [vmem:[%s2973_s1 + $0x130] sm:$0xff] (!%p152_p3)   ;;  %v2390_v47 = vld [vmem:[%s2973_s1 + $0x138] sm:$0xff] (!%p152_p3)   ;;  %v2391_v63 = vld [vmem:[%s2973_s1] sm:$0xff] (!%p152_p3)  }
   0xf   : > { %2125 = vmatpush3.bf16.msra.mxu1 (!%p152_p3), %v2377_v2  ;;  %v2659_v1 = vld [vmem:[%s2973_s1 + $0x140] sm:$0xff] (!%p152_p3)   ;;  %vm2700_vm5 = vmor (!%p152_p3), %vm525_vm3, %vm526_vm4  ;;  %v2446_v38 = vld [vmem:[%s2973_s1 + $0x208] sm:$0xff] (!%p152_p3)  }
  0x10   : > { %s2991_s13 = smov (!%p179_p5, %s2479_s13), 1  ;;  %2205 = vmatpush3.bf16.msra.mxu0 %v2378_v3  ;;  %2126 = vmatprep.subr.bf16.mxu1 %v2379_v4 }
  0x11   : > { %s2334_s4 = smul.u32 80, %s2991_s13  ;;  %2206 = vmatprep.subr.bf16.mxu0 %v2380_v5  ;;  %s1754_s8 = sshll.u32 %s2991_s13, 3 }
  0x13   : > { %s183_s11 = scalar_lea.vmem %s2972_s0, %s2334_s4  ;;  %2127 = vmatpush3.bf16.msra.mxu1 %v2379_v4 }
  0x14   : > { %2207 = vmatpush3.bf16.msra.mxu0 %v2380_v5  ;;  %2128 = vmatprep.subr.bf16.mxu1 %v2381_v6  ;;  %s2582_s24 = scalar_lea.vmem %s183_s11, %s2029_s19 }
  0x15   : > { %2208 = vmatprep.subr.bf16.mxu0 %v2382_v7  ;;  %v2588_v11 = vld [vmem:[%s2582_s24] sm:$0xf]  ;;  %v2591_v12 = vld [vmem:[%s2582_s24 + $0x8] sm:$0xf]  ;;  %v2594_v13 = vld [vmem:[%s2582_s24 + $0x4] sm:$0x1] }
  0x16   : > { %v2600_v15 = vld [vmem:[%s2582_s24 + $0xc] sm:$0x1]  ;;  %v227_v16 = vshrl.u32 %v2588_v11, 16  ;;  %v230_v17 = vshll.u32 %v2588_v11, 16  ;;  %v236_v18 = vshll.u32 %v2594_v13, 16  ;;  %v241_v19 = vshrl.u32 %v2591_v12, 16 }
  0x17   : > { %2129 = vmatpush3.bf16.msra.mxu1 %v2381_v6  ;;  %v244_v20 = vshll.u32 %v2591_v12, 16  ;;  %v250_v21 = vshll.u32 %v2600_v15, 16  ;;  %v1857_v30 = vld [vmem:[%s2582_s24 + $0x8] sm:$0xf]  ;;  %v2616_v31 = vld [vmem:[%s2582_s24 + $0xc] sm:$0x1] }
  0x18   : > { %2209 = vmatpush3.bf16.msra.mxu0 %v2382_v7  ;;  %2130 = vmatprep.subr.bf16.mxu1 %v2383_v8  ;;  %v229_v24 = vrot.slane %v227_v16, 4  ;;  %v232_v25 = vrot.slane %v230_v17, 5  ;;  %v238_v26 = vrot.slane %v236_v18, 5  ;;  %v243_v27 = vrot.slane %v241_v19, 4  ;;  %v1859_v33 = vld [vmem:[%s2582_s24 + $0x10] sm:$0xf] }
  0x19   : > { %2210 = vmatprep.subr.bf16.mxu0 %v2384_v9  ;;  %v246_v28 = vrot.slane %v244_v20, 5  ;;  %v252_v29 = vrot.slane %v250_v21, 5  ;;  %v2620_v34 = vld [vmem:[%s2582_s24 + $0x14] sm:$0x1]  ;;  %v817_v35 = vshrl.u32 %v1857_v30, 16  ;;  %v820_v36 = vshll.u32 %v1857_v30, 16 }
  0x1a   : > { %v233_v32 = vor.u32 %v232_v25, %v229_v24  ;;  %v826_v40 = vshll.u32 %v2616_v31, 16  ;;  %v831_v41 = vshrl.u32 %v1859_v33, 16  ;;  %v834_v42 = vshll.u32 %v1859_v33, 16  ;;  %v2637_v51 = vld [vmem:[%s2582_s24 + $0x10] sm:$0xf] }
  0x1b   : > { %2131 = vmatpush3.bf16.msra.mxu1 %v2383_v8  ;;  %v247_v39 = vor.u32 %v246_v28, %v243_v27  ;;  %v819_v44 = vrot.slane %v817_v35, 4  ;;  %v822_v45 = vrot.slane %v820_v36, 5  ;;  %v840_v46 = vshll.u32 %v2620_v34, 16  ;;  %v2642_v55 = vld [vmem:[%s2582_s24 + $0x18] sm:$0xf] }
  0x1c   : > { %2211 = vmatpush3.bf16.msra.mxu0 %v2384_v9  ;;  %2132 = vmatprep.subr.bf16.mxu1 %v2385_v10  ;;  %v234_v43 = vrot.slane %v233_v32, 4  ;;  %v833_v49 = vrot.slane %v831_v41, 4  ;;  %v836_v50 = vrot.slane %v834_v42, 5  ;;  %v828_v54 = vrot.slane %v826_v40, 5  ;;  %v2645_v56 = vld [vmem:[%s2582_s24 + $0x14] sm:$0x1] }
  0x1d   : > { %2212 = vmatprep.subr.bf16.mxu0 %v2386_v14  ;;  %v248_v48 = vrot.slane %v247_v39, 4  ;;  %v823_v53 = vor.u32 %v822_v45, %v819_v44  ;;  %v842_v59 = vrot.slane %v840_v46, 5  ;;  %v2650_v60 = vld [vmem:[%s2582_s24 + $0x1c] sm:$0x1]  ;;  %v255_v61 = vshrl.u32 %v2637_v51, 16 }
  0x1e   : > { %v239_v52 = vsel %vm2627_vm2, %v234_v43, %v238_v26  ;;  %v837_v58 = vor.u32 %v836_v50, %v833_v49  ;;  %v258_v2 = vshll.u32 %v2637_v51, 16  ;;  %v264_v3 = vshll.u32 %v2645_v56, 16  ;;  %v1861_v8 = vld [vmem:[%s2582_s24 + $0x18] sm:$0xf]  ;;  %v2670_v16 = vld [vmem:[%s2582_s24 + $0x1c] sm:$0x1] }
  0x1f   : > { %2133 = vmatpush3.bf16.msra.mxu1 %v2385_v10  ;;  %v253_v57 = vsel %vm2627_vm2, %v248_v48, %v252_v29  ;;  %v824_v0 = vrot.slane %v823_v53, 4  ;;  %v257_v5 = vrot.slane %v255_v61, 4  ;;  %v269_v6 = vshrl.u32 %v2642_v55, 16  ;;  %v1863_v17 = vld [vmem:[%s2582_s24 + $0x20] sm:$0xf]  ;;  %v2393_v43 = vld [vmem:[%s2973_s1 + $0x8] sm:$0xff]  }
  0x20   : > { %2213 = vmatpush3.bf16.msra.mxu0 %v2386_v14  ;;  %2134 = vmatprep.subr.bf16.mxu1 %v2387_v22  ;;  %v1775_v62 = vcombine.low %v239_v52, %v253_v57  ;;  %v838_v4 = vrot.slane %v837_v58, 4  ;;  %v272_v7 = vshll.u32 %v2642_v55, 16  ;;  %v260_v10 = vrot.slane %v258_v2, 5  ;;  %v2676_v21 = vld [vmem:[%s2582_s24 + $0x24] sm:$0x1]  ;;  %v2394_v58 = vld [vmem:[%s2973_s1 + $0x148] sm:$0xff]  }
  0x21   : > { %2214 = vmatprep.subr.bf16.mxu0 %v2388_v23  ;;  %v829_v9 = vsel %vm2627_vm2, %v824_v0, %v828_v54  ;;  %v278_v14 = vshll.u32 %v2650_v60, 16  ;;  %v271_v19 = vrot.slane %v269_v6, 4  ;;  %v266_v24 = vrot.slane %v264_v3, 5  ;;  %v2396_v0 = vld [vmem:[%s2973_s1 + $0x150] sm:$0xff]   ;;  %v1891_v2 = vld [vmem:[%s2582_s24 + $0x8] sm:$0xe] }
  0x22   : > { %2138 = vmatprep.mubr.bf16.mxu1 %v1775_v62  ;;  %v843_v18 = vsel %vm2627_vm2, %v838_v4, %v842_v59  ;;  %v274_v20 = vrot.slane %v272_v7, 5  ;;  %v845_v27 = vshrl.u32 %v1861_v8, 16  ;;  %v848_v28 = vshll.u32 %v1861_v8, 16  ;;  %v2397_v62 = vld [vmem:[%s2973_s1 + $0x18] sm:$0xff]   ;;  %v1892_v3 = vld [vmem:[%s2582_s24 + $0x10] sm:$0xe] }
  0x23   : > { %2135 = vmatpush3.bf16.msra.mxu1 %v2387_v22  ;;  %v1881_v22 = vcombine.low %v829_v9, %v843_v18  ;;  %v280_v25 = vrot.slane %v278_v14, 5  ;;  %v854_v29 = vshll.u32 %v2670_v16, 16  ;;  %v859_v32 = vshrl.u32 %v1863_v17, 16  ;;  %v2401_v8 = vld [vmem:[%s2973_s1 + $0x28] sm:$0xff]   ;;  %v2400_v9 = vld [vmem:[%s2973_s1 + $0x160] sm:$0xff]  }
  0x24   : > { %2215 = vmatpush3.bf16.msra.mxu0 %v2388_v23  ;;  %2136 = vmatprep.subr.bf16.mxu1 %v2389_v37  ;;  %v261_v23 = vor.u32 %v260_v10, %v257_v5  ;;  %v275_v26 = vor.u32 %v274_v20, %v271_v19  ;;  %v862_v33 = vshll.u32 %v1863_v17, 16  ;;  %v868_v35 = vshll.u32 %v2676_v21, 16  ;;  %v2403_v10 = vld [vmem:[%s2973_s1 + $0x30] sm:$0xff]   ;;  %v2402_v17 = vld [vmem:[%s2973_s1 + $0x168] sm:$0xff]  }
  0x25   : > { %2216 = vmatprep.subr.bf16.mxu0 %v2390_v47  ;;  %2218 = vmatprep.mubr.bf16.mxu0 %v1881_v22  ;;  %v850_v39 = vrot.slane %v848_v28, 5  ;;  %v861_v41 = vrot.slane %v859_v32, 4  ;;  %v1785_v44 = vcombine.low %v2588_v11, %v2591_v12  ;;  %v2395_v12 = vld [vmem:[%s2973_s1 + $0x10] sm:$0xff]   ;;  %v1012_v61 = vrot.slane %v2616_v31, 5  ;;  %v2399_v31 = vld [vmem:[%s2973_s1 + $0x20] sm:$0xff]  }
  0x26   : > { %v262_v30 = vrot.slane %v261_v23, 4  ;;  %v276_v36 = vrot.slane %v275_v26, 4  ;;  %v864_v42 = vrot.slane %v862_v33, 5  ;;  %v870_v48 = vrot.slane %v868_v35, 5  ;;  %v2404_v22 = vld [vmem:[%s2973_s1 + $0x170] sm:$0xff]  }
  0x27   : > { %2137 = vmatpush3.bf16.msra.mxu1 %v2389_v37  ;;  %v847_v37 = vrot.slane %v845_v27, 4  ;;  %v1895_v4 = vrot.slane %v1891_v2, 9  ;;  %v1896_v5 = vrot.slane %v1892_v3, 9  ;;  %v530_v14 = vrot.slane %v2594_v13, 5  ;;  %v2405_v13 = vld [vmem:[%s2973_s1 + $0x38] sm:$0xff]   ;;  %v2421_v2 = vld [vmem:[%s2973_s1 + $0xb0] sm:$0xff]  }
  0x28   : > { %2217 = vmatpush3.bf16.msra.mxu0 %v2390_v47  ;;  %2142 = vmatprep.subr.bf16.mxu1 %v2391_v63  ;;  %v267_v40 = vsel %vm2627_vm2, %v262_v30, %v266_v24  ;;  %v281_v45 = vsel %vm2627_vm2, %v276_v36, %v280_v25  ;;  %v856_v47 = vrot.slane %v854_v29, 5  ;;  %v865_v50 = vor.u32 %v864_v42, %v861_v41  ;;  %v1893_v23 = vld [vmem:[%s2582_s24 + $0x18] sm:$0xe]  ;;  %v1894_v24 = vld [vmem:[%s2582_s24 + $0x20] sm:$0xe]  ;;  %v2420_v3 = vld [vmem:[%s2973_s1 + $0x1a8] sm:$0xff]  }
  0x29   : > { %2222 = vmatprep.subr.bf16.mxu0 %v2659_v1  ;;  %v851_v46 = vor.u32 %v850_v39, %v847_v37  ;;  %v1776_v49 = vcombine.low %v267_v40, %v281_v45  ;;  %v534_v18 = vrot.slane %v2600_v15, 5  ;;  %v538_v19 = vrot.slane %v2645_v56, 5  ;;  %v2408_v56 = vld [vmem:[%s2973_s1 + $0x80] sm:$0xff]   ;;  %v514_v26 = vld [vmem:[%s2582_s24 + $0x8] sm:$0xe] }
  0x2a   : > { %v866_v53 = vrot.slane %v865_v50, 4  ;;  %v1020_v20 = vrot.slane %v2670_v16, 5  ;;  %v1024_v15 = vrot.slane %v2676_v21, 5  ;;  %v513_v16 = vld [vmem:[%s2582_s24] sm:$0xe]  ;;  %v1897_v25 = vrot.slane %v1893_v23, 9 }
  0x2b   : > { %v852_v52 = vrot.slane %v851_v46, 4  ;;  %2139 = vmatmul.mubr.bf16.vlgmr.msra.gmra.mrb[0].mxu1 %v1776_v49  ;;  %v1795_v27 = vrot.slane %v513_v16, 9  ;;  %v1898_v28 = vrot.slane %v1894_v24, 9  ;;  %v1796_v29 = vrot.slane %v514_v26, 9  ;;  %v2406_v21 = vld [vmem:[%s2973_s1 + $0x178] sm:$0xff]  }
  0x2c   : > { %2143 = vmatpush3.bf16.msra.mxu1 %v2391_v63  ;;  %2158 = vmatprep.mubr.bf16.mxu1 %v1785_v44  ;;  %v871_v11 = vsel %vm2627_vm2, %v866_v53, %v870_v48  ;;  %v1016_v63 = vrot.slane %v2620_v34, 5  ;;  %v2398_v34 = vld [vmem:[%s2973_s1 + $0x158] sm:$0xff]   ;;  %v542_v30 = vrot.slane %v2650_v60, 5  ;;  %v1786_v33 = vcombine.low %v2637_v51, %v2642_v55  ;;  %v515_v36 = vld [vmem:[%s2582_s24 + $0x10] sm:$0xe]  ;;  %v2411_v51 = vld [vmem:[%s2973_s1 + $0x88] sm:$0xff]  }
  0x2d   : > { %v857_v54 = vsel %vm2627_vm2, %v852_v52, %v856_v47  ;;  %2144 = vmatprep.subr.bf16.mxu1 %v2393_v43  ;;  %v531_v32 = vsel %vm2700_vm5, %v1795_v27, %v530_v14  ;;  %v535_v35 = vsel %vm2700_vm5, %v1796_v29, %v534_v18  ;;  %v516_v37 = vld [vmem:[%s2582_s24 + $0x18] sm:$0xe]  ;;  %v1797_v40 = vrot.slane %v515_v36, 9  ;;  %v2409_v55 = vld [vmem:[%s2973_s1 + $0x180] sm:$0xff]   ;;  %v2412_v47 = vld [vmem:[%s2973_s1 + $0x188] sm:$0xff]  }
  0x2e   : > { %v1882_v57 = vcombine.low %v857_v54, %v871_v11  ;;  %v1017_v6 = vsel %vm2700_vm5, %v1896_v5, %v1016_v63  ;;  %v1815_v39 = vcombine.low %v531_v32, %v535_v35  ;;  %v1798_v60 = vrot.slane %v516_v37, 9  ;;  %v2413_v48 = vld [vmem:[%s2973_s1 + $0x90] sm:$0xff]   ;;  %v2415_v50 = vld [vmem:[%s2973_s1 + $0x98] sm:$0xff]   ;;  %v2417_v53 = vld [vmem:[%s2973_s1 + $0xa0] sm:$0xff]  }
  0x2f   : > { %v1021_v41 = vsel %vm2700_vm5, %v1897_v25, %v1020_v20  ;;  %v1025_v42 = vsel %vm2700_vm5, %v1898_v28, %v1024_v15  ;;  %v2426_v49 = vld [vmem:[%s2582_s24 + $0x10] ss:$8 sps:$4 sm:$0xff]   ;;  %v2419_v11 = vld [vmem:[%s2973_s1 + $0xa8] sm:$0xff]   ;;  %v2824_v5 = vld [vmem:[%s2582_s24 + $0x1c] sm:$0x1] }
  0x30   : > { %2219 = vmatmul.mubr.bf16.vlgmr.msra.gmra.mrb[0].mxu0 %v1882_v57  ;;  %2145 = vmatpush3.bf16.msra.mxu1 %v2393_v43  ;;  %v2779_v43 = vsel %vm2700_vm5, %v1797_v40, %v538_v19  ;;  %v2783_v44 = vsel %vm2700_vm5, %v1798_v60, %v542_v30  ;;  %v1916_v46 = vcombine.low %v1021_v41, %v1025_v42  ;;  %v2414_v52 = vld [vmem:[%s2973_s1 + $0x190] sm:$0xff]   ;;  %v2416_v54 = vld [vmem:[%s2973_s1 + $0x198] sm:$0xff]   ;;  %v2418_v57 = vld [vmem:[%s2973_s1 + $0x1a0] sm:$0xff]  }
  0x31   : > { %2223 = vmatpush3.bf16.msra.mxu0 %v2659_v1  ;;  %2146 = vmatprep.subr.bf16.mxu1 %v2395_v12  ;;  %v1013_v1 = vsel %vm2700_vm5, %v1895_v4, %v1012_v61  ;;  %v1816_v45 = vcombine.low %v2779_v43, %v2783_v44  ;;  %v2821_v4 = vld [vmem:[%s2582_s24 + $0x14] sm:$0x1]  ;;  %v2425_v18 = vld [vmem:[%s2973_s1 + $0xc0] sm:$0xff]   ;;  %v2424_v19 = vld [vmem:[%s2973_s1 + $0x1b8] sm:$0xff]  }
  0x32   : > { %2224 = vmatprep.subr.bf16.mxu0 %v2394_v58  ;;  %v1915_v7 = vcombine.low %v1013_v1, %v1017_v6  ;;  %v2443_v24 = vld [vmem:[%s2582_s24 + $0x8] ss:$8 sps:$4 sm:$0xff]   ;;  %v2433_v30 = vld [vmem:[%s2973_s1 + $0xd8] sm:$0xff]   ;;  %v2435_v32 = vld [vmem:[%s2973_s1 + $0xe0] sm:$0xff]  }
  0x33   : > { %v2429_v15 = vld [vmem:[%s2973_s1 + $0xc8] sm:$0xff]   ;;  %v2431_v27 = vld [vmem:[%s2973_s1 + $0xd0] sm:$0xff]   ;;  %v1961_v35 = vld [vmem:[%s2582_s24 + $0x20] sm:$0xf] }
  0x34   : > { %2147 = vmatpush3.bf16.msra.mxu1 %v2395_v12  ;;  %2238 = vmatprep.mubr.bf16.mxu0 %v1915_v7  ;;  %v1957_v12 = vld [vmem:[%s2582_s24 + $0x10] sm:$0xf]  ;;  %v2423_v7 = vld [vmem:[%s2973_s1 + $0xb8] sm:$0xff]   ;;  %v2428_v26 = vld [vmem:[%s2582_s24 + $0x20] ss:$8 sps:$4 sm:$0xff]   ;;  %v1330_v40 = vshll.u32 %v1961_v35, 16 }
  0x35   : > { %2225 = vmatpush3.bf16.msra.mxu0 %v2394_v58  ;;  %2148 = vmatprep.subr.bf16.mxu1 %v2397_v62  ;;  %v1959_v58 = vld [vmem:[%s2582_s24 + $0x18] sm:$0xf]  ;;  %v1299_v61 = vshrl.u32 %v1957_v12, 16  ;;  %v2430_v28 = vld [vmem:[%s2973_s1 + $0x1c8] sm:$0xff]   ;;  %v2436_v42 = vld [vmem:[%s2973_s1 + $0x1e0] sm:$0xff]  }
  0x36   : > { %2226 = vmatprep.subr.bf16.mxu0 %v2396_v0  ;;  %v1313_v63 = vshrl.u32 %v1959_v58, 16  ;;  %v1963_v36 = vld [vmem:[%s2582_s24 + $0x28] sm:$0xf]  ;;  %v1332_v43 = vrot.slane %v1330_v40, 5 }
  0x37   : > { %v2437_v37 = vld [vmem:[%s2973_s1 + $0xe8] sm:$0xff]   ;;  %v1341_v60 = vshrl.u32 %v1963_v36, 16  ;;  %v1344_v41 = vshll.u32 %v1963_v36, 16 }
  0x38   : > { %2149 = vmatpush3.bf16.msra.mxu1 %v2397_v62  ;;  %v1302_v62 = vshll.u32 %v1957_v12, 16  ;;  %v1315_v1 = vrot.slane %v1313_v63, 4  ;;  %v1991_v12 = vld [vmem:[%s2582_s24 + $0x10] sm:$0xe] }
  0x39   : > { %2227 = vmatpush3.bf16.msra.mxu0 %v2396_v0  ;;  %2150 = vmatprep.subr.bf16.mxu1 %v2399_v31  ;;  %v1316_v0 = vshll.u32 %v1959_v58, 16  ;;  %v1343_v44 = vrot.slane %v1341_v60, 4 }
  0x3a   : > { %2228 = vmatprep.subr.bf16.mxu0 %v2398_v34 }
  0x3b   : > { %v1318_v6 = vrot.slane %v1316_v0, 5  ;;  %v2442_v0 = vld [vmem:[%s2973_s1 + $0x1f8] sm:$0xff]  }
  0x3c   : > { %2151 = vmatpush3.bf16.msra.mxu1 %v2399_v31  ;;  %v1301_v31 = vrot.slane %v1299_v61, 4 }
  0x3d   : > { %2229 = vmatpush3.bf16.msra.mxu0 %v2398_v34  ;;  %2152 = vmatprep.subr.bf16.mxu1 %v2401_v8  ;;  %v1304_v34 = vrot.slane %v1302_v62, 5 }
  0x3e   : > { %2230 = vmatprep.subr.bf16.mxu0 %v2400_v9 }
  0x3f   : > { %v1305_v14 = vor.u32 %v1304_v34, %v1301_v31  ;;  %v1498_v34 = vrot.slane %v2824_v5, 5 }
  0x40   : > { %2153 = vmatpush3.bf16.msra.mxu1 %v2401_v8  ;;  %v2422_v8 = vld [vmem:[%s2973_s1 + $0x1b0] sm:$0xff]  }
  0x41   : > { %2231 = vmatpush3.bf16.msra.mxu0 %v2400_v9  ;;  %2154 = vmatprep.subr.bf16.mxu1 %v2403_v10  ;;  %v1308_v9 = vshll.u32 %v2821_v4, 16  ;;  %v1306_v20 = vrot.slane %v1305_v14, 4  ;;  %v2447_v14 = vld [vmem:[%s2973_s1 + $0x210] sm:$0xff]  }
  0x42   : > { %2232 = vmatprep.subr.bf16.mxu0 %v2402_v17 }
  0x44   : > { %2155 = vmatpush3.bf16.msra.mxu1 %v2403_v10  ;;  %v1322_v10 = vshll.u32 %v2824_v5, 16 }
  0x45   : > { %2233 = vmatpush3.bf16.msra.mxu0 %v2402_v17  ;;  %2156 = vmatprep.subr.bf16.mxu1 %v2405_v13  ;;  %v1319_v17 = vor.u32 %v1318_v6, %v1315_v1  ;;  %v2444_v1 = vld [vmem:[%s2582_s24 + $0x18] ss:$8 sps:$4 sm:$0xff]  }
  0x46   : > { %2234 = vmatprep.subr.bf16.mxu0 %v2404_v22  ;;  %v1324_v23 = vrot.slane %v1322_v10, 5 }
  0x48   : > { %2157 = vmatpush3.bf16.msra.mxu1 %v2405_v13  ;;  %v1320_v13 = vrot.slane %v1319_v17, 4  ;;  %v2448_v17 = vld [vmem:[%s2973_s1 + $0x218] sm:$0xff]  }
  0x49   : > { %2235 = vmatpush3.bf16.msra.mxu0 %v2404_v22  ;;  %2162 = vmatprep.subr.bf16.mxu1 %v2408_v56  ;;  %v1310_v22 = vrot.slane %v1308_v9, 5 }
  0x4a   : > { %2236 = vmatprep.subr.bf16.mxu0 %v2406_v21  ;;  %v1325_v25 = vsel %vm2627_vm2, %v1320_v13, %v1324_v23  ;;  %v1994_v13 = vld [vmem:[%s2582_s24 + $0x28] sm:$0xe] }
  0x4b   : > { %2159 = vmatmul.mubr.bf16.vlgmr.msra.gmra.mrb[0].mxu1 %v1786_v33  ;;  %v1311_v16 = vsel %vm2627_vm2, %v1306_v20, %v1310_v22  ;;  %v2434_v33 = vld [vmem:[%s2973_s1 + $0x1d8] sm:$0xff]   ;;  %v2451_v20 = vld [vmem:[%s2973_s1 + $0x230] sm:$0xff]   ;;  %v1993_v22 = vld [vmem:[%s2582_s24 + $0x20] sm:$0xe] }
  0x4c   : > { %2163 = vmatpush3.bf16.msra.mxu1 %v2408_v56  ;;  %2178 = vmatprep.mubr.bf16.mxu1 %v1815_v39  ;;  %v2427_v56 = vld [vmem:[%s2973_s1 + $0x1c0] sm:$0xff]   ;;  %v1981_v29 = vcombine.low %v1311_v16, %v1325_v25  ;;  %v1327_v39 = vshrl.u32 %v1961_v35, 16  ;;  %v1997_v23 = vrot.slane %v1993_v22, 9  ;;  %v2452_v16 = vld [vmem:[%s2973_s1 + $0x238] sm:$0xff]  }
  0x4d   : > { %2237 = vmatpush3.bf16.msra.mxu0 %v2406_v21  ;;  %2164 = vmatprep.subr.bf16.mxu1 %v2411_v51  ;;  %v2432_v21 = vld [vmem:[%s2973_s1 + $0x1d0] sm:$0xff]  }
  0x4e   : > { %2242 = vmatprep.subr.bf16.mxu0 %v2409_v55 }
  0x50   : > { %2239 = vmatmul.mubr.bf16.vlgmr.msra.gmra.mrb[0].mxu0 %v1916_v46  ;;  %2165 = vmatpush3.bf16.msra.mxu1 %v2411_v51  ;;  %v2439_v51 = vld [vmem:[%s2973_s1 + $0xf0] sm:$0xff]   ;;  %v2438_v46 = vld [vmem:[%s2973_s1 + $0x1e8] sm:$0xff]  }
  0x51   : > { %2243 = vmatpush3.bf16.msra.mxu0 %v2409_v55  ;;  %2166 = vmatprep.subr.bf16.mxu1 %v2413_v48  ;;  %v1329_v55 = vrot.slane %v1327_v39, 4 }
  0x52   : > { %2244 = vmatprep.subr.bf16.mxu0 %v2412_v47  ;;  %2258 = vmatprep.mubr.bf16.mxu0 %v2426_v49  ;;  %v2441_v49 = vld [vmem:[%s2973_s1 + $0xf8] sm:$0xff]  }
  0x54   : > { %2167 = vmatpush3.bf16.msra.mxu1 %v2413_v48  ;;  %v2891_v48 = vld [vmem:[%s2582_s24 + $0x2c] sm:$0x1] }
  0x55   : > { %2245 = vmatpush3.bf16.msra.mxu0 %v2412_v47  ;;  %2168 = vmatprep.subr.bf16.mxu1 %v2415_v50  ;;  %v2888_v47 = vld [vmem:[%s2582_s24 + $0x24] sm:$0x1] }
  0x56   : > { %2246 = vmatprep.subr.bf16.mxu0 %v2414_v52 }
  0x58   : > { %2169 = vmatpush3.bf16.msra.mxu1 %v2415_v50  ;;  %v1333_v50 = vor.u32 %v1332_v43, %v1329_v55 }
  0x59   : > { %2247 = vmatpush3.bf16.msra.mxu0 %v2414_v52  ;;  %2170 = vmatprep.subr.bf16.mxu1 %v2417_v53  ;;  %v1336_v52 = vshll.u32 %v2888_v47, 16 }
  0x5a   : > { %2248 = vmatprep.subr.bf16.mxu0 %v2416_v54  ;;  %v1334_v58 = vrot.slane %v1333_v50, 4 }
  0x5b   : > { %v1338_v61 = vrot.slane %v1336_v52, 5 }
  0x5c   : > { %2171 = vmatpush3.bf16.msra.mxu1 %v2417_v53 }
  0x5d   : > { %2249 = vmatpush3.bf16.msra.mxu0 %v2416_v54  ;;  %2172 = vmatprep.subr.bf16.mxu1 %v2419_v11  ;;  %v1350_v54 = vshll.u32 %v2891_v48, 16  ;;  %v1339_v6 = vsel %vm2627_vm2, %v1334_v58, %v1338_v61 }
  0x5e   : > { %2250 = vmatprep.subr.bf16.mxu0 %v2418_v57 }
  0x5f   : > { %v1352_v63 = vrot.slane %v1350_v54, 5 }
  0x60   : > { %2173 = vmatpush3.bf16.msra.mxu1 %v2419_v11  ;;  %v2440_v11 = vld [vmem:[%s2973_s1 + $0x1f0] sm:$0xff]  }
  0x61   : > { %2251 = vmatpush3.bf16.msra.mxu0 %v2418_v57  ;;  %2174 = vmatprep.subr.bf16.mxu1 %v2421_v2  ;;  %v1992_v57 = vld [vmem:[%s2582_s24 + $0x18] sm:$0xe]  ;;  %s1753_s24 = sshll.u32 %s2475_s12, 2 }
  0x62   : > { %2252 = vmatprep.subr.bf16.mxu0 %v2420_v3  ;;  %v1996_v31 = vrot.slane %v1992_v57, 9  ;;  %p187_p6 = scmp.lt.s32.totalorder %s1753_s24, 7 }
  0x64   : > { %2175 = vmatpush3.bf16.msra.mxu1 %v2421_v2  ;;  %v1995_v2 = vrot.slane %v1991_v12, 9  ;;  %v1499_v5 = vsel %vm2700_vm5, %v1996_v31, %v1498_v34  ;;  %s2993_s24 = smov (!%p187_p6, %s1753_s24), 7 }
  0x65   : > { %2253 = vmatpush3.bf16.msra.mxu0 %v2420_v3  ;;  %2176 = vmatprep.subr.bf16.mxu1 %v2423_v7  ;;  %v1494_v3 = vrot.slane %v2821_v4, 5  ;;  %s190_s9 = sadd.s32 %s1754_s8, %s2993_s24 }
  0x66   : > { %2254 = vmatprep.subr.bf16.mxu0 %v2422_v8  ;;  %s1755_s19 = sshll.u32 %s190_s9, 3 }
  0x67   : > { %v1495_v4 = vsel %vm2700_vm5, %v1995_v2, %v1494_v3  ;;  %s192_s12 = scalar_lea.vmem %s2975_s3, %s1755_s19 }
  0x68   : > { %2177 = vmatpush3.bf16.msra.mxu1 %v2423_v7  ;;  %v2015_v10 = vcombine.low %v1495_v4, %v1499_v5 }
  0x69   : > { %2255 = vmatpush3.bf16.msra.mxu0 %v2422_v8  ;;  %2182 = vmatprep.subr.bf16.mxu1 %v2425_v18  ;;  %v2445_v8 = vld [vmem:[%s2973_s1 + $0x200] sm:$0xff]  }
  0x6a   : > { %2256 = vmatprep.subr.bf16.mxu0 %v2424_v19 }
  0x6b   : > { %2179 = vmatmul.mubr.bf16.vlgmr.msra.gmra.mrb[0].mxu1 %v1816_v45  ;;  %v1346_v45 = vrot.slane %v1344_v41, 5 }
  0x6c   : > { %2183 = vmatpush3.bf16.msra.mxu1 %v2425_v18  ;;  %2198 = vmatprep.mubr.bf16.mxu1 %v2443_v24  ;;  %v2449_v18 = vld [vmem:[%s2973_s1 + $0x220] sm:$0xff]   ;;  %v1502_v24 = vrot.slane %v2888_v47, 5 }
  0x6d   : > { %2257 = vmatpush3.bf16.msra.mxu0 %v2424_v19  ;;  %2184 = vmatprep.subr.bf16.mxu1 %v2429_v15  ;;  %v1347_v53 = vor.u32 %v1346_v45, %v1343_v44  ;;  %v2450_v19 = vld [vmem:[%s2973_s1 + $0x228] sm:$0xff]  }
  0x6e   : > { %2262 = vmatprep.subr.bf16.mxu0 %v2427_v56  ;;  %v1503_v25 = vsel %vm2700_vm5, %v1997_v23, %v1502_v24 }
  0x6f   : > { %v1348_v62 = vrot.slane %v1347_v53, 4 }
  0x70   : > { %2259 = vmatmul.mubr.bf16.vlgmr.msra.gmra.mrb[0].mxu0 %v2428_v26  ;;  %2185 = vmatpush3.bf16.msra.mxu1 %v2429_v15  ;;  %v1998_v15 = vrot.slane %v1994_v13, 9 }
  0x71   : > { %2263 = vmatpush3.bf16.msra.mxu0 %v2427_v56  ;;  %2186 = vmatprep.subr.bf16.mxu1 %v2431_v27  ;;  %v1353_v7 = vsel %vm2627_vm2, %v1348_v62, %v1352_v63  ;;  %v1506_v56 = vrot.slane %v2891_v48, 5 }
  0x72   : > { %2264 = vmatprep.subr.bf16.mxu0 %v2430_v28  ;;  %2278 = vmatprep.mubr.bf16.mxu0 %v1981_v29  ;;  %v1982_v9 = vcombine.low %v1339_v6, %v1353_v7 }
  0x73   : > { %v1507_v26 = vsel %vm2700_vm5, %v1998_v15, %v1506_v56 }
  0x74   : > { %2187 = vmatpush3.bf16.msra.mxu1 %v2431_v27  ;;  %v2016_v27 = vcombine.low %v1503_v25, %v1507_v26 }
  0x75   : > { %2265 = vmatpush3.bf16.msra.mxu0 %v2430_v28  ;;  %2188 = vmatprep.subr.bf16.mxu1 %v2433_v30 }
  0x76   : > { %2266 = vmatprep.subr.bf16.mxu0 %v2432_v21 }
  0x78   : > { %2189 = vmatpush3.bf16.msra.mxu1 %v2433_v30 }
  0x79   : > { %2267 = vmatpush3.bf16.msra.mxu0 %v2432_v21  ;;  %2190 = vmatprep.subr.bf16.mxu1 %v2435_v32 }
  0x7a   : > { %2268 = vmatprep.subr.bf16.mxu0 %v2434_v33 }
  0x7c   : > { %2191 = vmatpush3.bf16.msra.mxu1 %v2435_v32 }
  0x7d   : > { %2269 = vmatpush3.bf16.msra.mxu0 %v2434_v33  ;;  %2192 = vmatprep.subr.bf16.mxu1 %v2437_v37  ;;  %v2025_v33 = vld [vmem:[%s2974_s2] ss:$0 sm:$0xff] }
  0x7e   : > { %2270 = vmatprep.subr.bf16.mxu0 %v2436_v42 }
  0x80   : > { %2193 = vmatpush3.bf16.msra.mxu1 %v2437_v37 }
  0x81   : > { %2271 = vmatpush3.bf16.msra.mxu0 %v2436_v42  ;;  %2194 = vmatprep.subr.bf16.mxu1 %v2439_v51 }
  0x82   : > { %2272 = vmatprep.subr.bf16.mxu0 %v2438_v46 }
  0x84   : > { %2195 = vmatpush3.bf16.msra.mxu1 %v2439_v51 }
  0x85   : > { %2273 = vmatpush3.bf16.msra.mxu0 %v2438_v46  ;;  %2196 = vmatprep.subr.bf16.mxu1 %v2441_v49 }
  0x86   : > { %2274 = vmatprep.subr.bf16.mxu0 %v2440_v11 }
  0x88   : > { %2197 = vmatpush3.bf16.msra.mxu1 %v2441_v49 }
  0x89   : > { %2275 = vmatpush3.bf16.msra.mxu0 %v2440_v11 }
  0x8a   : > { %2276 = vmatprep.subr.bf16.mxu0 %v2442_v0 }
  0x8b   : > { %2199 = vmatmul.mubr.bf16.vlgmr.msra.gmra.mrb[0].mxu1 %v2444_v1 }
  0x8d   : > { %2277 = vmatpush3.bf16.msra.mxu0 %v2442_v0 }
  0x8e   : > { %2282 = vmatprep.subr.bf16.mxu0 %v2445_v8 }
  0x90   : > { %2279 = vmatmul.mubr.bf16.vlgmr.msra.gmra.mrb[0].mxu0 %v1982_v9 }
  0x91   : > { %2283 = vmatpush3.bf16.msra.mxu0 %v2445_v8  ;;  %2298 = vmatprep.mubr.bf16.mxu0 %v2015_v10 }
  0x92   : > { %2284 = vmatprep.subr.bf16.mxu0 %v2446_v38 }
  0x95   : > { %2285 = vmatpush3.bf16.msra.mxu0 %v2446_v38 }
  0x96   : > { %2286 = vmatprep.subr.bf16.mxu0 %v2447_v14 }
  0x99   : > { %2287 = vmatpush3.bf16.msra.mxu0 %v2447_v14 }
  0x9a   : > { %2288 = vmatprep.subr.bf16.mxu0 %v2448_v17 }
  0x9d   : > { %2289 = vmatpush3.bf16.msra.mxu0 %v2448_v17 }
  0x9e   : > { %2290 = vmatprep.subr.bf16.mxu0 %v2449_v18 }
  0xa1   : > { %2291 = vmatpush3.bf16.msra.mxu0 %v2449_v18 }
  0xa2   : > { %2292 = vmatprep.subr.bf16.mxu0 %v2450_v19 }
  0xa5   : > { %2293 = vmatpush3.bf16.msra.mxu0 %v2450_v19 }
  0xa6   : > { %2294 = vmatprep.subr.bf16.mxu0 %v2451_v20 }
  0xa9   : > { %2295 = vmatpush3.bf16.msra.mxu0 %v2451_v20 }
  0xaa   : > { %2296 = vmatprep.subr.bf16.mxu0 %v2452_v16 }
  0xad   : > { %2297 = vmatpush3.bf16.msra.mxu0 %v2452_v16 }
  0xb0   : > { %2299 = vmatmul.mubr.bf16.vlgmr.msra.gmra.mrb[0].mxu0 %v2016_v27 }
 0x15e   : > { %v2200_v28 = vpop.f32.mrb[0].mxu1 }
 0x15f   : > { %v789_v29 = vpop.f32.mrb[1].mxu1 }
 0x160   : > { %v2201_v30 = vpop.f32.mrb[2].mxu1 }
 0x161   : > { %v792_v21 = vpop.f32.mrb[3].mxu1 }
 0x183   : > { %v2300_v32 = vpop.f32.mrb[0].mxu0 }
 0x184   : > { %v2302_v59 = vadd.f32 %v2300_v32, %v2200_v28  ;;  %v1615_v35 = vpop.f32.mrb[1].mxu0 }
 0x185   : > { %v2303_v36 = vadd.f32 %v1615_v35, %v789_v29  ;;  %v2301_v37 = vpop.f32.mrb[2].mxu0 }
 0x186   : > { %v1643_v39 = vadd.f32 %v2302_v59, %v2025_v33  ;;  %v2304_v40 = vadd.f32 %v2301_v37, %v2201_v30  ;;  %v1618_v60 = vpop.f32.mrb[3].mxu0 }
 0x187   : > { %v1641_v41 = vadd.f32 %v2303_v36, %v2025_v33  ;;  %v2305_v42 = vadd.f32 %v1618_v60, %v792_v21 }
 0x188   : > { %v1647_v51 = vmax.f32 %v1643_v39, 0.0  ;;  %v1644_v55 = vadd.f32 %v2304_v40, %v2025_v33 }
 0x189   : > { %v1645_v43 = vmax.f32 %v1641_v41, 0.0  ;;  %v1642_v44 = vadd.f32 %v2305_v42, %v2025_v33 }
 0x18a   : > { %1651 = vst [vmem:[%s192_s12 + $0x10] sm:$0xff] %v1647_v51  ;;  %v1648_v45 = vmax.f32 %v1644_v55, 0.0 }
 0x18b   : > { %1649 = vst [vmem:[%s192_s12] sm:$0xff] %v1645_v43  ;;  %v1646_v46 = vmax.f32 %v1642_v44, 0.0 }
 0x18c   : > { %1652 = vst [vmem:[%s192_s12 + $0x18] sm:$0xff] %v1648_v45 }
 0x18d   : > { %1650 = vst [vmem:[%s192_s12 + $0x8] sm:$0xff] %v1646_v46 }
 0x18e PF: > { %s13_s16 = sadd.s32 1, %s2491_s16   ;;  %s2980_s12 = smov %s2483_s14 }
 0x18f   : > { %p10_p7 = scmp.ge.s32.totalorder %s13_s16, 6   ;;  %s2981_s13 = smov %s2487_s15 }
 0x190   : > { %s2982_s14 = smov %s2985_s17  ;;  %s2983_s15 = smov %s2989_s18 }
 0x191   :  { %12 = sbr.rel (!%p10_p7) target bundleno = 3 (0x3), region = 73 }

</bundles_post_ra>
